<compile_context>
chip_gen: v7x
topology: tpu7x:2x2x1
jax: 0.10.0
libtpu: 0.0.40
codegen_flags: <defaults>
</compile_context>

<pallas_src>
import math

import jax
import jax.numpy as jnp
from jax import lax
from jax.experimental import pallas as pl
from jax.experimental.pallas import tpu as pltpu

EPS = 1e-5                      # GPT-2 layer_norm_epsilon
GELU_C = math.sqrt(2.0 / math.pi)

_COMPILER_PARAMS = pltpu.CompilerParams(
    dimension_semantics=("parallel",),        # shard the batch grid across TCs
    vmem_limit_bytes=32 * 1024 * 1024,        # explicit budget, safe on v5e/v6e/v7x
)


def _layernorm_f32(x, gamma, beta):
    mean = jnp.mean(x, axis=-1, keepdims=True)
    var = jnp.mean((x - mean) ** 2, axis=-1, keepdims=True)
    return (x - mean) * lax.rsqrt(var + EPS) * gamma + beta


# ---------------------------------------------------------------- kernels ---

def make_block_kernel(apply_final_ln):
    """One fused GPT-2 block (optionally followed by the final LayerNorm)."""

    def kernel(x_ref, ln1_g, ln1_b,
               wq_ref, wk_ref, wv_ref, bq_ref, bk_ref, bv_ref,
               wap_ref, bap_ref,
               ln2_g, ln2_b, wfc_ref, bfc_ref, wmp_ref, bmp_ref,
               *tail):
        if apply_final_ln:
            lnf_g, lnf_b, o_ref = tail
        else:
            (o_ref,) = tail

        nh, hidden, hd = wq_ref.shape
        seq = x_ref.shape[1]

        x = x_ref[0].astype(jnp.float32)                               # (S, H)

        # ---------------- attention sub-block -----------------------------
        h = _layernorm_f32(x, ln1_g[...], ln1_b[...])                  # (S, H) f32
        hb = jnp.broadcast_to(h.astype(jnp.bfloat16)[None], (nh, seq, hidden))

        def proj(w_ref, bias_ref):                                     # -> (NH, S, HD)
            acc = lax.dot_general(hb, w_ref[...],
                                  (((2,), (1,)), ((0,), (0,))),
                                  preferred_element_type=jnp.float32)
            return acc + bias_ref[...]

        q = proj(wq_ref, bq_ref)          # 1/sqrt(HD) folded into wq/bq
        k = proj(wk_ref, bk_ref)
        v = proj(wv_ref, bv_ref)

        # scores over all heads at once: (NH, S, S); f32 softmax statistics
        s = lax.dot_general(q.astype(jnp.bfloat16), k.astype(jnp.bfloat16),
                            (((2,), (2,)), ((0,), (0,))),
                            preferred_element_type=jnp.float32)
        row = lax.broadcasted_iota(jnp.int32, (nh, seq, seq), 1)
        col = lax.broadcasted_iota(jnp.int32, (nh, seq, seq), 2)
        s = jnp.where(col <= row, s, jnp.float32(-1e30))               # causal mask
        s = s - jnp.max(s, axis=-1, keepdims=True)
        p = jnp.exp(s)
        p = p * pl.reciprocal(jnp.sum(p, axis=-1, keepdims=True), approx=True)

        # per-head attention output: (NH, S, HD)
        a = lax.dot_general(p.astype(jnp.bfloat16), v.astype(jnp.bfloat16),
                            (((2,), (1,)), ((0,), (0,))),
                            preferred_element_type=jnp.float32)

        # head merge fused into the output projection: sum_h a[h] @ Wp[h]
        per_head = lax.dot_general(a.astype(jnp.bfloat16), wap_ref[...],
                                   (((2,), (1,)), ((0,), (0,))),
                                   preferred_element_type=jnp.float32)  # (NH, S, H)
        x = x + jnp.sum(per_head, axis=0) + bap_ref[...]               # + residual

        # ---------------- MLP sub-block ------------------------------------
        h2 = _layernorm_f32(x, ln2_g[...], ln2_b[...])
        act = jnp.dot(h2.astype(jnp.bfloat16), wfc_ref[...],
                      preferred_element_type=jnp.float32) + bfc_ref[...]   # (S, FFN)
        # GPT-2 "gelu_new" (tanh approximation) as a matmul epilogue (EUP slot)
        act = 0.5 * act * (1.0 + jnp.tanh(GELU_C * (act + 0.044715 * act * act * act)))
        x = x + (jnp.dot(act.astype(jnp.bfloat16), wmp_ref[...],
                         preferred_element_type=jnp.float32) + bmp_ref[...])  # + residual

        if apply_final_ln:
            x = _layernorm_f32(x, lnf_g[...], lnf_b[...])

        o_ref[0] = x.astype(o_ref.dtype)

    return kernel


def final_ln_kernel(x_ref, g_ref, b_ref, o_ref):
    x = x_ref[0].astype(jnp.float32)
    o_ref[0] = _layernorm_f32(x, g_ref[...], b_ref[...]).astype(o_ref.dtype)


# --------------------------------------------------------------- wrappers ---

def _full_spec(shape):
    rank = len(shape)
    return pl.BlockSpec(shape, lambda b, _r=rank: (0,) * _r)


def gpt2_block(x, lp, final_ln=None):
    """One fused GPT-2 block; optionally folds the final LayerNorm in."""
    B, S, H = x.shape
    xspec = pl.BlockSpec((1, S, H), lambda b: (b, 0, 0))

    in_arrays = [
        x,
        lp["ln1_g"], lp["ln1_b"],
        lp["wq"], lp["wk"], lp["wv"],
        lp["bq"], lp["bk"], lp["bv"],
        lp["wproj"], lp["bproj"],
        lp["ln2_g"], lp["ln2_b"],
        lp["wfc"], lp["bfc"], lp["wmlp"], lp["bmlp"],
    ]
    if final_ln is not None:
        in_arrays += list(final_ln)

    in_specs = [xspec] + [_full_spec(a.shape) for a in in_arrays[1:]]

    return pl.pallas_call(
        make_block_kernel(final_ln is not None),
        out_shape=jax.ShapeDtypeStruct((B, S, H), x.dtype),
        grid=(B,),
        in_specs=in_specs,
        out_specs=xspec,
        compiler_params=_COMPILER_PARAMS,
    )(*in_arrays)


def final_layernorm(x, gamma, beta):
    B, S, H = x.shape
    xspec = pl.BlockSpec((1, S, H), lambda b: (b, 0, 0))
    return pl.pallas_call(
        final_ln_kernel,
        out_shape=jax.ShapeDtypeStruct((B, S, H), x.dtype),
        grid=(B,),
        in_specs=[xspec, _full_spec((1, H)), _full_spec((1, H))],
        out_specs=xspec,
        compiler_params=_COMPILER_PARAMS,
    )(x, gamma, beta)


# ------------------------------------------------------------ GPT-2 model ---

def init_params(key, vocab, max_pos, hidden, n_heads, n_layers, ffn):
    """Parameters in the natural GPT-2 layout, deterministic from `key`."""
    std = 0.02
    keys = iter(jax.random.split(key, 4 + n_layers * 4))
    p = {
        "wte": jax.random.normal(next(keys), (vocab, hidden), jnp.float32) * std,
        "wpe": jax.random.normal(next(keys), (max_pos, hidden), jnp.float32) * std,
        "ln_f_g": jnp.ones((1, hidden), jnp.float32),
        "ln_f_b": jnp.zeros((1, hidden), jnp.float32),
        "layers": [],
    }
    for _ in range(n_layers):
        p["layers"].append({
            "ln1_g": jnp.ones((1, hidden), jnp.float32),
            "ln1_b": jnp.zeros((1, hidden), jnp.float32),
            "w_attn": jax.random.normal(next(keys), (hidden, 3 * hidden), jnp.float32) * std,
            "b_attn": jnp.zeros((1, 3 * hidden), jnp.float32),
            "w_attn_proj": jax.random.normal(next(keys), (hidden, hidden), jnp.float32) * std,
            "b_attn_proj": jnp.zeros((1, hidden), jnp.float32),
            "ln2_g": jnp.ones((1, hidden), jnp.float32),
            "ln2_b": jnp.zeros((1, hidden), jnp.float32),
            "w_fc": jax.random.normal(next(keys), (hidden, ffn), jnp.float32) * std,
            "b_fc": jnp.zeros((1, ffn), jnp.float32),
            "w_mlp_proj": jax.random.normal(next(keys), (ffn, hidden), jnp.float32) * std,
            "b_mlp_proj": jnp.zeros((1, hidden), jnp.float32),
        })
    return p


def prepare_params(raw, n_heads):
    """One-time weight prep: head-major layout, bf16 MXU weights, folded scale."""
    H = raw["wte"].shape[1]
    HD = H // n_heads
    scale = 1.0 / math.sqrt(HD)

    def prep_layer(layer):
        w_attn, b_attn = layer["w_attn"], layer["b_attn"]

        def head_w(off, s=1.0):                    # (H, H) -> (NH, H, HD)
            m = w_attn[:, off * H:(off + 1) * H] * s
            return m.reshape(H, n_heads, HD).transpose(1, 0, 2).astype(jnp.bfloat16)

        def head_b(off, s=1.0):                    # (1, H) -> (NH, 1, HD)
            bb = b_attn[:, off * H:(off + 1) * H] * s
            return bb.reshape(n_heads, 1, HD).astype(jnp.float32)

        return {
            "ln1_g": layer["ln1_g"], "ln1_b": layer["ln1_b"],
            "wq": head_w(0, scale), "wk": head_w(1), "wv": head_w(2),
            "bq": head_b(0, scale), "bk": head_b(1), "bv": head_b(2),
            "wproj": layer["w_attn_proj"].reshape(n_heads, HD, H).astype(jnp.bfloat16),
            "bproj": layer["b_attn_proj"],
            "ln2_g": layer["ln2_g"], "ln2_b": layer["ln2_b"],
            "wfc": layer["w_fc"].astype(jnp.bfloat16), "bfc": layer["b_fc"],
            "wmlp": layer["w_mlp_proj"].astype(jnp.bfloat16), "bmlp": layer["b_mlp_proj"],
        }

    return {
        "wte": raw["wte"], "wpe": raw["wpe"],
        "ln_f_g": raw["ln_f_g"], "ln_f_b": raw["ln_f_b"],
        "layers": [prep_layer(l) for l in raw["layers"]],
    }


def tabular_baseline_forward(params, inputs, labels):
    # inputs: (B, S) int32 token ids.  `labels` is unused (module forward is `pass`);
    # we return the transformer's last_hidden_state.
    del labels
    B, S = inputs.shape
    pos = jnp.arange(S, dtype=jnp.int32)
    # TODO(synk): embedding table gather stays in plain JAX (no Pallas gather here).
    x = params["wte"][inputs] + params["wpe"][pos][None, :, :]          # (B, S, H) f32

    layers = params["layers"]
    n_layers = len(layers)
    for i, lp in enumerate(layers):
        fl = (params["ln_f_g"], params["ln_f_b"]) if i == n_layers - 1 else None
        x = gpt2_block(x, lp, final_ln=fl)   # one fused pallas_call per layer

    if n_layers == 0:                         # degenerate case: standalone final LN
        x = final_layernorm(x, params["ln_f_g"], params["ln_f_b"])
    return x                                  # last_hidden_state


# ------------------------------------------------------------------- main ---

if __name__ == "__main__":
    B, S = 2, 8
    H, NH, L = 32, 4, 2
    FFN = 4 * H
    VOCAB, MAX_POS = 64, 16

    key = jax.random.PRNGKey(0)
    k_param, k_in, k_lab = jax.random.split(key, 3)

    raw_params = init_params(k_param, VOCAB, MAX_POS, H, NH, L, FFN)
    params = prepare_params(raw_params, NH)
    inputs = jax.random.randint(k_in, (B, S), 0, VOCAB, dtype=jnp.int32)
    labels = jax.random.randint(k_lab, (B, S), 0, VOCAB, dtype=jnp.int32)  # unused

    fwd = jax.jit(tabular_baseline_forward)
    out = fwd(params, inputs, labels)
    out = jax.block_until_ready(out)
    assert out.shape == (B, S, H) and out.dtype == jnp.float32
    print("KERNEL_OK")
</pallas_src>

<mosaic_0001>
module attributes {stable_mosaic.version = 11 : i64} {
  func.func @kernel(%arg0: i32, %arg1: memref<1x8x32xf32, #tpu.memory_space<vmem>>, %arg2: memref<1x32xf32, #tpu.memory_space<vmem>>, %arg3: memref<1x32xf32, #tpu.memory_space<vmem>>, %arg4: memref<4x32x8xbf16, #tpu.memory_space<vmem>>, %arg5: memref<4x32x8xbf16, #tpu.memory_space<vmem>>, %arg6: memref<4x32x8xbf16, #tpu.memory_space<vmem>>, %arg7: memref<4x1x8xf32, #tpu.memory_space<vmem>>, %arg8: memref<4x1x8xf32, #tpu.memory_space<vmem>>, %arg9: memref<4x1x8xf32, #tpu.memory_space<vmem>>, %arg10: memref<4x8x32xbf16, #tpu.memory_space<vmem>>, %arg11: memref<1x32xf32, #tpu.memory_space<vmem>>, %arg12: memref<1x32xf32, #tpu.memory_space<vmem>>, %arg13: memref<1x32xf32, #tpu.memory_space<vmem>>, %arg14: memref<32x128xbf16, #tpu.memory_space<vmem>>, %arg15: memref<1x128xf32, #tpu.memory_space<vmem>>, %arg16: memref<128x32xbf16, #tpu.memory_space<vmem>>, %arg17: memref<1x32xf32, #tpu.memory_space<vmem>>, %arg18: memref<1x32xf32, #tpu.memory_space<vmem>>, %arg19: memref<1x32xf32, #tpu.memory_space<vmem>>, %arg20: memref<1x8x32xf32, #tpu.memory_space<vmem>>) attributes {dimension_semantics = [#tpu.dimension_semantics<parallel>], iteration_bounds = array<i64: 2>, scalar_prefetch = 0 : i64, scratch_operands = 0 : i64, tpu.core_type = #tpu.core_type<tc>, window_params = [{transform_indices = @transform_0, window_bounds = array<i64: 1, 8, 32>}, {pipeline_mode = #tpu.pipeline_mode<synchronous>, transform_indices = @transform_1, window_bounds = array<i64: 1, 32>}, {pipeline_mode = #tpu.pipeline_mode<synchronous>, transform_indices = @transform_2, window_bounds = array<i64: 1, 32>}, {pipeline_mode = #tpu.pipeline_mode<synchronous>, transform_indices = @transform_3, window_bounds = array<i64: 4, 32, 8>}, {pipeline_mode = #tpu.pipeline_mode<synchronous>, transform_indices = @transform_4, window_bounds = array<i64: 4, 32, 8>}, {pipeline_mode = #tpu.pipeline_mode<synchronous>, transform_indices = @transform_5, window_bounds = array<i64: 4, 32, 8>}, {pipeline_mode = #tpu.pipeline_mode<synchronous>, transform_indices = @transform_6, window_bounds = array<i64: 4, 1, 8>}, {pipeline_mode = #tpu.pipeline_mode<synchronous>, transform_indices = @transform_7, window_bounds = array<i64: 4, 1, 8>}, {pipeline_mode = #tpu.pipeline_mode<synchronous>, transform_indices = @transform_8, window_bounds = array<i64: 4, 1, 8>}, {pipeline_mode = #tpu.pipeline_mode<synchronous>, transform_indices = @transform_9, window_bounds = array<i64: 4, 8, 32>}, {pipeline_mode = #tpu.pipeline_mode<synchronous>, transform_indices = @transform_10, window_bounds = array<i64: 1, 32>}, {pipeline_mode = #tpu.pipeline_mode<synchronous>, transform_indices = @transform_11, window_bounds = array<i64: 1, 32>}, {pipeline_mode = #tpu.pipeline_mode<synchronous>, transform_indices = @transform_12, window_bounds = array<i64: 1, 32>}, {pipeline_mode = #tpu.pipeline_mode<synchronous>, transform_indices = @transform_13, window_bounds = array<i64: 32, 128>}, {pipeline_mode = #tpu.pipeline_mode<synchronous>, transform_indices = @transform_14, window_bounds = array<i64: 1, 128>}, {pipeline_mode = #tpu.pipeline_mode<synchronous>, transform_indices = @transform_15, window_bounds = array<i64: 128, 32>}, {pipeline_mode = #tpu.pipeline_mode<synchronous>, transform_indices = @transform_16, window_bounds = array<i64: 1, 32>}, {pipeline_mode = #tpu.pipeline_mode<synchronous>, transform_indices = @transform_17, window_bounds = array<i64: 1, 32>}, {pipeline_mode = #tpu.pipeline_mode<synchronous>, transform_indices = @transform_18, window_bounds = array<i64: 1, 32>}, {transform_indices = @transform_19, window_bounds = array<i64: 1, 8, 32>}]} {
    %c0 = arith.constant 0 : index
    %c0_0 = arith.constant 0 : index
    %c0_1 = arith.constant 0 : index
    %0 = vector.load %arg1[%c0, %c0_0, %c0_1] : memref<1x8x32xf32, #tpu.memory_space<vmem>>, vector<1x8x32xf32>
    %1 = vector.shape_cast %0 : vector<1x8x32xf32> to vector<8x32xf32>
    %c0_2 = arith.constant 0 : index
    %c0_3 = arith.constant 0 : index
    %2 = vector.load %arg2[%c0_2, %c0_3] : memref<1x32xf32, #tpu.memory_space<vmem>>, vector<1x32xf32>
    %c0_4 = arith.constant 0 : index
    %c0_5 = arith.constant 0 : index
    %3 = vector.load %arg3[%c0_4, %c0_5] : memref<1x32xf32, #tpu.memory_space<vmem>>, vector<1x32xf32>
    %cst = arith.constant dense<0.000000e+00> : vector<8xf32>
    %4 = vector.multi_reduction <add>, %1, %cst [1] : vector<8x32xf32> to vector<8xf32>
    %5 = vector.shape_cast %4 : vector<8xf32> to vector<8x1xf32>
    %cst_6 = arith.constant 3.200000e+01 : f32
    %6 = vector.broadcast %cst_6 : f32 to vector<8x1xf32>
    %7 = arith.divf %5, %6 : vector<8x1xf32>
    %8 = vector.broadcast %7 : vector<8x1xf32> to vector<8x32xf32>
    %9 = arith.subf %1, %8 : vector<8x32xf32>
    %10 = arith.mulf %9, %9 : vector<8x32xf32>
    %cst_7 = arith.constant dense<0.000000e+00> : vector<8xf32>
    %11 = vector.multi_reduction <add>, %10, %cst_7 [1] : vector<8x32xf32> to vector<8xf32>
    %12 = vector.shape_cast %11 : vector<8xf32> to vector<8x1xf32>
    %cst_8 = arith.constant 3.200000e+01 : f32
    %13 = vector.broadcast %cst_8 : f32 to vector<8x1xf32>
    %14 = arith.divf %12, %13 : vector<8x1xf32>
    %15 = vector.broadcast %7 : vector<8x1xf32> to vector<8x32xf32>
    %16 = arith.subf %1, %15 : vector<8x32xf32>
    %cst_9 = arith.constant 9.99999974E-6 : f32
    %17 = vector.broadcast %cst_9 : f32 to vector<8x1xf32>
    %18 = arith.addf %14, %17 : vector<8x1xf32>
    %19 = math.rsqrt %18 : vector<8x1xf32>
    %20 = vector.broadcast %19 : vector<8x1xf32> to vector<8x32xf32>
    %21 = arith.mulf %16, %20 : vector<8x32xf32>
    %22 = vector.broadcast %2 : vector<1x32xf32> to vector<8x32xf32>
    %23 = arith.mulf %21, %22 : vector<8x32xf32>
    %24 = vector.broadcast %3 : vector<1x32xf32> to vector<8x32xf32>
    %25 = arith.addf %23, %24 : vector<8x32xf32>
    %26 = arith.truncf %25 : vector<8x32xf32> to vector<8x32xbf16>
    %27 = vector.shape_cast %26 : vector<8x32xbf16> to vector<1x8x32xbf16>
    %28 = vector.shape_cast %27 : vector<1x8x32xbf16> to vector<1x8x32xbf16>
    %29 = vector.broadcast %28 : vector<1x8x32xbf16> to vector<4x8x32xbf16>
    %c0_10 = arith.constant 0 : index
    %c0_11 = arith.constant 0 : index
    %c0_12 = arith.constant 0 : index
    %30 = vector.load %arg4[%c0_10, %c0_11, %c0_12] : memref<4x32x8xbf16, #tpu.memory_space<vmem>>, vector<4x32x8xbf16>
    %cst_13 = arith.constant dense<0.000000e+00> : vector<4x8x8xf32>
    %31 = tpu.matmul %29, %30, %cst_13 {dimension_numbers = #tpu.dot_dimension_numbers<[2], [1], [1], [2], [0, 0, 0, 1, 1, 2], [0], [0]>} : vector<4x8x32xbf16>, vector<4x32x8xbf16>, vector<4x8x8xf32> -> vector<4x8x8xf32>
    %c0_14 = arith.constant 0 : index
    %c0_15 = arith.constant 0 : index
    %c0_16 = arith.constant 0 : index
    %32 = vector.load %arg7[%c0_14, %c0_15, %c0_16] : memref<4x1x8xf32, #tpu.memory_space<vmem>>, vector<4x1x8xf32>
    %33 = vector.broadcast %32 : vector<4x1x8xf32> to vector<4x8x8xf32>
    %34 = arith.addf %31, %33 : vector<4x8x8xf32>
    %c0_17 = arith.constant 0 : index
    %c0_18 = arith.constant 0 : index
    %c0_19 = arith.constant 0 : index
    %35 = vector.load %arg5[%c0_17, %c0_18, %c0_19] : memref<4x32x8xbf16, #tpu.memory_space<vmem>>, vector<4x32x8xbf16>
    %cst_20 = arith.constant dense<0.000000e+00> : vector<4x8x8xf32>
    %36 = tpu.matmul %29, %35, %cst_20 {dimension_numbers = #tpu.dot_dimension_numbers<[2], [1], [1], [2], [0, 0, 0, 1, 1, 2], [0], [0]>} : vector<4x8x32xbf16>, vector<4x32x8xbf16>, vector<4x8x8xf32> -> vector<4x8x8xf32>
    %c0_21 = arith.constant 0 : index
    %c0_22 = arith.constant 0 : index
    %c0_23 = arith.constant 0 : index
    %37 = vector.load %arg8[%c0_21, %c0_22, %c0_23] : memref<4x1x8xf32, #tpu.memory_space<vmem>>, vector<4x1x8xf32>
    %38 = vector.broadcast %37 : vector<4x1x8xf32> to vector<4x8x8xf32>
    %39 = arith.addf %36, %38 : vector<4x8x8xf32>
    %c0_24 = arith.constant 0 : index
    %c0_25 = arith.constant 0 : index
    %c0_26 = arith.constant 0 : index
    %40 = vector.load %arg6[%c0_24, %c0_25, %c0_26] : memref<4x32x8xbf16, #tpu.memory_space<vmem>>, vector<4x32x8xbf16>
    %cst_27 = arith.constant dense<0.000000e+00> : vector<4x8x8xf32>
    %41 = tpu.matmul %29, %40, %cst_27 {dimension_numbers = #tpu.dot_dimension_numbers<[2], [1], [1], [2], [0, 0, 0, 1, 1, 2], [0], [0]>} : vector<4x8x32xbf16>, vector<4x32x8xbf16>, vector<4x8x8xf32> -> vector<4x8x8xf32>
    %c0_28 = arith.constant 0 : index
    %c0_29 = arith.constant 0 : index
    %c0_30 = arith.constant 0 : index
    %42 = vector.load %arg9[%c0_28, %c0_29, %c0_30] : memref<4x1x8xf32, #tpu.memory_space<vmem>>, vector<4x1x8xf32>
    %43 = vector.broadcast %42 : vector<4x1x8xf32> to vector<4x8x8xf32>
    %44 = arith.addf %41, %43 : vector<4x8x8xf32>
    %45 = arith.truncf %34 : vector<4x8x8xf32> to vector<4x8x8xbf16>
    %46 = arith.truncf %39 : vector<4x8x8xf32> to vector<4x8x8xbf16>
    %cst_31 = arith.constant dense<0.000000e+00> : vector<4x8x8xf32>
    %47 = tpu.matmul %45, %46, %cst_31 {dimension_numbers = #tpu.dot_dimension_numbers<[2], [2], [1], [1], [0, 0, 0, 1, 1, 1], [0], [0]>} : vector<4x8x8xbf16>, vector<4x8x8xbf16>, vector<4x8x8xf32> -> vector<4x8x8xf32>
    %48 = tpu.iota {dimensions = array<i32: 1>} : vector<4x8x8xi32>
    %49 = tpu.iota {dimensions = array<i32: 2>} : vector<4x8x8xi32>
    %50 = arith.cmpi sle, %49, %48 : vector<4x8x8xi32>
    %cst_32 = arith.constant -1.000000e+30 : f32
    %51 = vector.broadcast %cst_32 : f32 to vector<4x8x8xf32>
    %52 = arith.select %50, %47, %51 : vector<4x8x8xi1>, vector<4x8x8xf32>
    %cst_33 = arith.constant dense<0xFF800000> : vector<4x8xf32>
    %53 = vector.multi_reduction <maximumf>, %52, %cst_33 [2] : vector<4x8x8xf32> to vector<4x8xf32>
    %54 = vector.shape_cast %53 : vector<4x8xf32> to vector<4x8x1xf32>
    %55 = vector.broadcast %54 : vector<4x8x1xf32> to vector<4x8x8xf32>
    %56 = arith.subf %52, %55 : vector<4x8x8xf32>
    %57 = math.exp %56 : vector<4x8x8xf32>
    %cst_34 = arith.constant dense<0.000000e+00> : vector<4x8xf32>
    %58 = vector.multi_reduction <add>, %57, %cst_34 [2] : vector<4x8x8xf32> to vector<4x8xf32>
    %59 = vector.shape_cast %58 : vector<4x8xf32> to vector<4x8x1xf32>
    %60 = tpu.reciprocal %59 {approx = true} : vector<4x8x1xf32> -> vector<4x8x1xf32>
    %61 = vector.broadcast %60 : vector<4x8x1xf32> to vector<4x8x8xf32>
    %62 = arith.mulf %57, %61 : vector<4x8x8xf32>
    %63 = arith.truncf %62 : vector<4x8x8xf32> to vector<4x8x8xbf16>
    %64 = arith.truncf %44 : vector<4x8x8xf32> to vector<4x8x8xbf16>
    %cst_35 = arith.constant dense<0.000000e+00> : vector<4x8x8xf32>
    %65 = tpu.matmul %63, %64, %cst_35 {dimension_numbers = #tpu.dot_dimension_numbers<[2], [1], [1], [2], [0, 0, 0, 1, 1, 2], [0], [0]>} : vector<4x8x8xbf16>, vector<4x8x8xbf16>, vector<4x8x8xf32> -> vector<4x8x8xf32>
    %66 = arith.truncf %65 : vector<4x8x8xf32> to vector<4x8x8xbf16>
    %c0_36 = arith.constant 0 : index
    %c0_37 = arith.constant 0 : index
    %c0_38 = arith.constant 0 : index
    %67 = vector.load %arg10[%c0_36, %c0_37, %c0_38] : memref<4x8x32xbf16, #tpu.memory_space<vmem>>, vector<4x8x32xbf16>
    %cst_39 = arith.constant dense<0.000000e+00> : vector<4x8x32xf32>
    %68 = tpu.matmul %66, %67, %cst_39 {dimension_numbers = #tpu.dot_dimension_numbers<[2], [1], [1], [2], [0, 0, 0, 1, 1, 2], [0], [0]>} : vector<4x8x8xbf16>, vector<4x8x32xbf16>, vector<4x8x32xf32> -> vector<4x8x32xf32>
    %cst_40 = arith.constant dense<0.000000e+00> : vector<8x32xf32>
    %69 = vector.multi_reduction <add>, %68, %cst_40 [0] : vector<4x8x32xf32> to vector<8x32xf32>
    %70 = arith.addf %1, %69 : vector<8x32xf32>
    %c0_41 = arith.constant 0 : index
    %c0_42 = arith.constant 0 : index
    %71 = vector.load %arg11[%c0_41, %c0_42] : memref<1x32xf32, #tpu.memory_space<vmem>>, vector<1x32xf32>
    %72 = vector.broadcast %71 : vector<1x32xf32> to vector<8x32xf32>
    %73 = arith.addf %70, %72 : vector<8x32xf32>
    %c0_43 = arith.constant 0 : index
    %c0_44 = arith.constant 0 : index
    %74 = vector.load %arg12[%c0_43, %c0_44] : memref<1x32xf32, #tpu.memory_space<vmem>>, vector<1x32xf32>
    %c0_45 = arith.constant 0 : index
    %c0_46 = arith.constant 0 : index
    %75 = vector.load %arg13[%c0_45, %c0_46] : memref<1x32xf32, #tpu.memory_space<vmem>>, vector<1x32xf32>
    %cst_47 = arith.constant dense<0.000000e+00> : vector<8xf32>
    %76 = vector.multi_reduction <add>, %73, %cst_47 [1] : vector<8x32xf32> to vector<8xf32>
    %77 = vector.shape_cast %76 : vector<8xf32> to vector<8x1xf32>
    %cst_48 = arith.constant 3.200000e+01 : f32
    %78 = vector.broadcast %cst_48 : f32 to vector<8x1xf32>
    %79 = arith.divf %77, %78 : vector<8x1xf32>
    %80 = vector.broadcast %79 : vector<8x1xf32> to vector<8x32xf32>
    %81 = arith.subf %73, %80 : vector<8x32xf32>
    %82 = arith.mulf %81, %81 : vector<8x32xf32>
    %cst_49 = arith.constant dense<0.000000e+00> : vector<8xf32>
    %83 = vector.multi_reduction <add>, %82, %cst_49 [1] : vector<8x32xf32> to vector<8xf32>
    %84 = vector.shape_cast %83 : vector<8xf32> to vector<8x1xf32>
    %cst_50 = arith.constant 3.200000e+01 : f32
    %85 = vector.broadcast %cst_50 : f32 to vector<8x1xf32>
    %86 = arith.divf %84, %85 : vector<8x1xf32>
    %87 = vector.broadcast %79 : vector<8x1xf32> to vector<8x32xf32>
    %88 = arith.subf %73, %87 : vector<8x32xf32>
    %cst_51 = arith.constant 9.99999974E-6 : f32
    %89 = vector.broadcast %cst_51 : f32 to vector<8x1xf32>
    %90 = arith.addf %86, %89 : vector<8x1xf32>
    %91 = math.rsqrt %90 : vector<8x1xf32>
    %92 = vector.broadcast %91 : vector<8x1xf32> to vector<8x32xf32>
    %93 = arith.mulf %88, %92 : vector<8x32xf32>
    %94 = vector.broadcast %74 : vector<1x32xf32> to vector<8x32xf32>
    %95 = arith.mulf %93, %94 : vector<8x32xf32>
    %96 = vector.broadcast %75 : vector<1x32xf32> to vector<8x32xf32>
    %97 = arith.addf %95, %96 : vector<8x32xf32>
    %98 = arith.truncf %97 : vector<8x32xf32> to vector<8x32xbf16>
    %c0_52 = arith.constant 0 : index
    %c0_53 = arith.constant 0 : index
    %99 = vector.load %arg14[%c0_52, %c0_53] : memref<32x128xbf16, #tpu.memory_space<vmem>>, vector<32x128xbf16>
    %cst_54 = arith.constant dense<0.000000e+00> : vector<8x128xf32>
    %100 = tpu.matmul %98, %99, %cst_54 {dimension_numbers = #tpu.dot_dimension_numbers<[1], [0], [0], [1], [0, 0, 1, 1], [], []>} : vector<8x32xbf16>, vector<32x128xbf16>, vector<8x128xf32> -> vector<8x128xf32>
    %c0_55 = arith.constant 0 : index
    %c0_56 = arith.constant 0 : index
    %101 = vector.load %arg15[%c0_55, %c0_56] : memref<1x128xf32, #tpu.memory_space<vmem>>, vector<1x128xf32>
    %102 = vector.broadcast %101 : vector<1x128xf32> to vector<8x128xf32>
    %103 = arith.addf %100, %102 : vector<8x128xf32>
    %cst_57 = arith.constant 5.000000e-01 : f32
    %104 = vector.broadcast %cst_57 : f32 to vector<8x128xf32>
    %105 = arith.mulf %104, %103 : vector<8x128xf32>
    %cst_58 = arith.constant 4.471500e-02 : f32
    %106 = vector.broadcast %cst_58 : f32 to vector<8x128xf32>
    %107 = arith.mulf %106, %103 : vector<8x128xf32>
    %108 = arith.mulf %107, %103 : vector<8x128xf32>
    %109 = arith.mulf %108, %103 : vector<8x128xf32>
    %110 = arith.addf %103, %109 : vector<8x128xf32>
    %cst_59 = arith.constant 0.797884583 : f32
    %111 = vector.broadcast %cst_59 : f32 to vector<8x128xf32>
    %112 = arith.mulf %111, %110 : vector<8x128xf32>
    %113 = math.tanh %112 : vector<8x128xf32>
    %cst_60 = arith.constant 1.000000e+00 : f32
    %114 = vector.broadcast %cst_60 : f32 to vector<8x128xf32>
    %115 = arith.addf %114, %113 : vector<8x128xf32>
    %116 = arith.mulf %105, %115 : vector<8x128xf32>
    %117 = arith.truncf %116 : vector<8x128xf32> to vector<8x128xbf16>
    %c0_61 = arith.constant 0 : index
    %c0_62 = arith.constant 0 : index
    %118 = vector.load %arg16[%c0_61, %c0_62] : memref<128x32xbf16, #tpu.memory_space<vmem>>, vector<128x32xbf16>
    %cst_63 = arith.constant dense<0.000000e+00> : vector<8x32xf32>
    %119 = tpu.matmul %117, %118, %cst_63 {dimension_numbers = #tpu.dot_dimension_numbers<[1], [0], [0], [1], [0, 0, 1, 1], [], []>} : vector<8x128xbf16>, vector<128x32xbf16>, vector<8x32xf32> -> vector<8x32xf32>
    %c0_64 = arith.constant 0 : index
    %c0_65 = arith.constant 0 : index
    %120 = vector.load %arg17[%c0_64, %c0_65] : memref<1x32xf32, #tpu.memory_space<vmem>>, vector<1x32xf32>
    %121 = vector.broadcast %120 : vector<1x32xf32> to vector<8x32xf32>
    %122 = arith.addf %119, %121 : vector<8x32xf32>
    %123 = arith.addf %73, %122 : vector<8x32xf32>
    %c0_66 = arith.constant 0 : index
    %c0_67 = arith.constant 0 : index
    %124 = vector.load %arg18[%c0_66, %c0_67] : memref<1x32xf32, #tpu.memory_space<vmem>>, vector<1x32xf32>
    %c0_68 = arith.constant 0 : index
    %c0_69 = arith.constant 0 : index
    %125 = vector.load %arg19[%c0_68, %c0_69] : memref<1x32xf32, #tpu.memory_space<vmem>>, vector<1x32xf32>
    %cst_70 = arith.constant dense<0.000000e+00> : vector<8xf32>
    %126 = vector.multi_reduction <add>, %123, %cst_70 [1] : vector<8x32xf32> to vector<8xf32>
    %127 = vector.shape_cast %126 : vector<8xf32> to vector<8x1xf32>
    %cst_71 = arith.constant 3.200000e+01 : f32
    %128 = vector.broadcast %cst_71 : f32 to vector<8x1xf32>
    %129 = arith.divf %127, %128 : vector<8x1xf32>
    %130 = vector.broadcast %129 : vector<8x1xf32> to vector<8x32xf32>
    %131 = arith.subf %123, %130 : vector<8x32xf32>
    %132 = arith.mulf %131, %131 : vector<8x32xf32>
    %cst_72 = arith.constant dense<0.000000e+00> : vector<8xf32>
    %133 = vector.multi_reduction <add>, %132, %cst_72 [1] : vector<8x32xf32> to vector<8xf32>
    %134 = vector.shape_cast %133 : vector<8xf32> to vector<8x1xf32>
    %cst_73 = arith.constant 3.200000e+01 : f32
    %135 = vector.broadcast %cst_73 : f32 to vector<8x1xf32>
    %136 = arith.divf %134, %135 : vector<8x1xf32>
    %137 = vector.broadcast %129 : vector<8x1xf32> to vector<8x32xf32>
    %138 = arith.subf %123, %137 : vector<8x32xf32>
    %cst_74 = arith.constant 9.99999974E-6 : f32
    %139 = vector.broadcast %cst_74 : f32 to vector<8x1xf32>
    %140 = arith.addf %136, %139 : vector<8x1xf32>
    %141 = math.rsqrt %140 : vector<8x1xf32>
    %142 = vector.broadcast %141 : vector<8x1xf32> to vector<8x32xf32>
    %143 = arith.mulf %138, %142 : vector<8x32xf32>
    %144 = vector.broadcast %124 : vector<1x32xf32> to vector<8x32xf32>
    %145 = arith.mulf %143, %144 : vector<8x32xf32>
    %146 = vector.broadcast %125 : vector<1x32xf32> to vector<8x32xf32>
    %147 = arith.addf %145, %146 : vector<8x32xf32>
    %c0_75 = arith.constant 0 : index
    %c0_76 = arith.constant 0 : index
    %c0_77 = arith.constant 0 : index
    %148 = vector.load %arg20[%c0_75, %c0_76, %c0_77] : memref<1x8x32xf32, #tpu.memory_space<vmem>>, vector<1x8x32xf32>
    %149 = vector.shape_cast %148 : vector<1x8x32xf32> to vector<8x32xf32>
    %150 = vector.shape_cast %147 : vector<8x32xf32> to vector<1x8x32xf32>
    tpu.vector_store %arg20[%c0_75, %c0_76, %c0_77], %150 {strides = array<i32>} : memref<1x8x32xf32, #tpu.memory_space<vmem>>, vector<1x8x32xf32>,
    return
  }
  func.func @transform_0(%arg0: i32) -> (i32, i32, i32) {
    %c0_i32 = arith.constant 0 : i32
    %c0_i32_0 = arith.constant 0 : i32
    %c0_i32_1 = arith.constant 0 : i32
    return %arg0, %c0_i32, %c0_i32_0 : i32, i32, i32
  }
  func.func @transform_1(%arg0: i32) -> (i32, i32) {
    %c0_i32 = arith.constant 0 : i32
    %c0_i32_0 = arith.constant 0 : i32
    %c0_i32_1 = arith.constant 0 : i32
    return %c0_i32, %c0_i32_0 : i32, i32
  }
  func.func @transform_2(%arg0: i32) -> (i32, i32) {
    %c0_i32 = arith.constant 0 : i32
    %c0_i32_0 = arith.constant 0 : i32
    %c0_i32_1 = arith.constant 0 : i32
    return %c0_i32, %c0_i32_0 : i32, i32
  }
  func.func @transform_3(%arg0: i32) -> (i32, i32, i32) {
    %c0_i32 = arith.constant 0 : i32
    %c0_i32_0 = arith.constant 0 : i32
    %c0_i32_1 = arith.constant 0 : i32
    %c0_i32_2 = arith.constant 0 : i32
    return %c0_i32, %c0_i32_0, %c0_i32_1 : i32, i32, i32
  }
  func.func @transform_4(%arg0: i32) -> (i32, i32, i32) {
    %c0_i32 = arith.constant 0 : i32
    %c0_i32_0 = arith.constant 0 : i32
    %c0_i32_1 = arith.constant 0 : i32
    %c0_i32_2 = arith.constant 0 : i32
    return %c0_i32, %c0_i32_0, %c0_i32_1 : i32, i32, i32
  }
  func.func @transform_5(%arg0: i32) -> (i32, i32, i32) {
    %c0_i32 = arith.constant 0 : i32
    %c0_i32_0 = arith.constant 0 : i32
    %c0_i32_1 = arith.constant 0 : i32
    %c0_i32_2 = arith.constant 0 : i32
    return %c0_i32, %c0_i32_0, %c0_i32_1 : i32, i32, i32
  }
  func.func @transform_6(%arg0: i32) -> (i32, i32, i32) {
    %c0_i32 = arith.constant 0 : i32
    %c0_i32_0 = arith.constant 0 : i32
    %c0_i32_1 = arith.constant 0 : i32
    %c0_i32_2 = arith.constant 0 : i32
    return %c0_i32, %c0_i32_0, %c0_i32_1 : i32, i32, i32
  }
  func.func @transform_7(%arg0: i32) -> (i32, i32, i32) {
    %c0_i32 = arith.constant 0 : i32
    %c0_i32_0 = arith.constant 0 : i32
    %c0_i32_1 = arith.constant 0 : i32
    %c0_i32_2 = arith.constant 0 : i32
    return %c0_i32, %c0_i32_0, %c0_i32_1 : i32, i32, i32
  }
  func.func @transform_8(%arg0: i32) -> (i32, i32, i32) {
    %c0_i32 = arith.constant 0 : i32
    %c0_i32_0 = arith.constant 0 : i32
    %c0_i32_1 = arith.constant 0 : i32
    %c0_i32_2 = arith.constant 0 : i32
    return %c0_i32, %c0_i32_0, %c0_i32_1 : i32, i32, i32
  }
  func.func @transform_9(%arg0: i32) -> (i32, i32, i32) {
    %c0_i32 = arith.constant 0 : i32
    %c0_i32_0 = arith.constant 0 : i32
    %c0_i32_1 = arith.constant 0 : i32
    %c0_i32_2 = arith.constant 0 : i32
    return %c0_i32, %c0_i32_0, %c0_i32_1 : i32, i32, i32
  }
  func.func @transform_10(%arg0: i32) -> (i32, i32) {
    %c0_i32 = arith.constant 0 : i32
    %c0_i32_0 = arith.constant 0 : i32
    %c0_i32_1 = arith.constant 0 : i32
    return %c0_i32, %c0_i32_0 : i32, i32
  }
  func.func @transform_11(%arg0: i32) -> (i32, i32) {
    %c0_i32 = arith.constant 0 : i32
    %c0_i32_0 = arith.constant 0 : i32
    %c0_i32_1 = arith.constant 0 : i32
    return %c0_i32, %c0_i32_0 : i32, i32
  }
  func.func @transform_12(%arg0: i32) -> (i32, i32) {
    %c0_i32 = arith.constant 0 : i32
    %c0_i32_0 = arith.constant 0 : i32
    %c0_i32_1 = arith.constant 0 : i32
    return %c0_i32, %c0_i32_0 : i32, i32
  }
  func.func @transform_13(%arg0: i32) -> (i32, i32) {
    %c0_i32 = arith.constant 0 : i32
    %c0_i32_0 = arith.constant 0 : i32
    %c0_i32_1 = arith.constant 0 : i32
    return %c0_i32, %c0_i32_0 : i32, i32
  }
  func.func @transform_14(%arg0: i32) -> (i32, i32) {
    %c0_i32 = arith.constant 0 : i32
    %c0_i32_0 = arith.constant 0 : i32
    %c0_i32_1 = arith.constant 0 : i32
    return %c0_i32, %c0_i32_0 : i32, i32
  }
  func.func @transform_15(%arg0: i32) -> (i32, i32) {
    %c0_i32 = arith.constant 0 : i32
    %c0_i32_0 = arith.constant 0 : i32
    %c0_i32_1 = arith.constant 0 : i32
    return %c0_i32, %c0_i32_0 : i32, i32
  }
  func.func @transform_16(%arg0: i32) -> (i32, i32) {
    %c0_i32 = arith.constant 0 : i32
    %c0_i32_0 = arith.constant 0 : i32
    %c0_i32_1 = arith.constant 0 : i32
    return %c0_i32, %c0_i32_0 : i32, i32
  }
  func.func @transform_17(%arg0: i32) -> (i32, i32) {
    %c0_i32 = arith.constant 0 : i32
    %c0_i32_0 = arith.constant 0 : i32
    %c0_i32_1 = arith.constant 0 : i32
    return %c0_i32, %c0_i32_0 : i32, i32
  }
  func.func @transform_18(%arg0: i32) -> (i32, i32) {
    %c0_i32 = arith.constant 0 : i32
    %c0_i32_0 = arith.constant 0 : i32
    %c0_i32_1 = arith.constant 0 : i32
    return %c0_i32, %c0_i32_0 : i32, i32
  }
  func.func @transform_19(%arg0: i32) -> (i32, i32, i32) {
    %c0_i32 = arith.constant 0 : i32
    %c0_i32_0 = arith.constant 0 : i32
    %c0_i32_1 = arith.constant 0 : i32
    return %arg0, %c0_i32, %c0_i32_0 : i32, i32, i32
  }
}

module attributes {stable_mosaic.version = 11 : i64} {
  func.func @kernel(%arg0: i32, %arg1: memref<1x8x32xf32, #tpu.memory_space<vmem>>, %arg2: memref<1x32xf32, #tpu.memory_space<vmem>>, %arg3: memref<1x32xf32, #tpu.memory_space<vmem>>, %arg4: memref<4x32x8xbf16, #tpu.memory_space<vmem>>, %arg5: memref<4x32x8xbf16, #tpu.memory_space<vmem>>, %arg6: memref<4x32x8xbf16, #tpu.memory_space<vmem>>, %arg7: memref<4x1x8xf32, #tpu.memory_space<vmem>>, %arg8: memref<4x1x8xf32, #tpu.memory_space<vmem>>, %arg9: memref<4x1x8xf32, #tpu.memory_space<vmem>>, %arg10: memref<4x8x32xbf16, #tpu.memory_space<vmem>>, %arg11: memref<1x32xf32, #tpu.memory_space<vmem>>, %arg12: memref<1x32xf32, #tpu.memory_space<vmem>>, %arg13: memref<1x32xf32, #tpu.memory_space<vmem>>, %arg14: memref<32x128xbf16, #tpu.memory_space<vmem>>, %arg15: memref<1x128xf32, #tpu.memory_space<vmem>>, %arg16: memref<128x32xbf16, #tpu.memory_space<vmem>>, %arg17: memref<1x32xf32, #tpu.memory_space<vmem>>, %arg18: memref<1x8x32xf32, #tpu.memory_space<vmem>>) attributes {dimension_semantics = [#tpu.dimension_semantics<parallel>], iteration_bounds = array<i64: 2>, scalar_prefetch = 0 : i64, scratch_operands = 0 : i64, tpu.core_type = #tpu.core_type<tc>, window_params = [{transform_indices = @transform_0, window_bounds = array<i64: 1, 8, 32>}, {pipeline_mode = #tpu.pipeline_mode<synchronous>, transform_indices = @transform_1, window_bounds = array<i64: 1, 32>}, {pipeline_mode = #tpu.pipeline_mode<synchronous>, transform_indices = @transform_2, window_bounds = array<i64: 1, 32>}, {pipeline_mode = #tpu.pipeline_mode<synchronous>, transform_indices = @transform_3, window_bounds = array<i64: 4, 32, 8>}, {pipeline_mode = #tpu.pipeline_mode<synchronous>, transform_indices = @transform_4, window_bounds = array<i64: 4, 32, 8>}, {pipeline_mode = #tpu.pipeline_mode<synchronous>, transform_indices = @transform_5, window_bounds = array<i64: 4, 32, 8>}, {pipeline_mode = #tpu.pipeline_mode<synchronous>, transform_indices = @transform_6, window_bounds = array<i64: 4, 1, 8>}, {pipeline_mode = #tpu.pipeline_mode<synchronous>, transform_indices = @transform_7, window_bounds = array<i64: 4, 1, 8>}, {pipeline_mode = #tpu.pipeline_mode<synchronous>, transform_indices = @transform_8, window_bounds = array<i64: 4, 1, 8>}, {pipeline_mode = #tpu.pipeline_mode<synchronous>, transform_indices = @transform_9, window_bounds = array<i64: 4, 8, 32>}, {pipeline_mode = #tpu.pipeline_mode<synchronous>, transform_indices = @transform_10, window_bounds = array<i64: 1, 32>}, {pipeline_mode = #tpu.pipeline_mode<synchronous>, transform_indices = @transform_11, window_bounds = array<i64: 1, 32>}, {pipeline_mode = #tpu.pipeline_mode<synchronous>, transform_indices = @transform_12, window_bounds = array<i64: 1, 32>}, {pipeline_mode = #tpu.pipeline_mode<synchronous>, transform_indices = @transform_13, window_bounds = array<i64: 32, 128>}, {pipeline_mode = #tpu.pipeline_mode<synchronous>, transform_indices = @transform_14, window_bounds = array<i64: 1, 128>}, {pipeline_mode = #tpu.pipeline_mode<synchronous>, transform_indices = @transform_15, window_bounds = array<i64: 128, 32>}, {pipeline_mode = #tpu.pipeline_mode<synchronous>, transform_indices = @transform_16, window_bounds = array<i64: 1, 32>}, {transform_indices = @transform_17, window_bounds = array<i64: 1, 8, 32>}]} {
    %c0 = arith.constant 0 : index
    %c0_0 = arith.constant 0 : index
    %c0_1 = arith.constant 0 : index
    %0 = vector.load %arg1[%c0, %c0_0, %c0_1] : memref<1x8x32xf32, #tpu.memory_space<vmem>>, vector<1x8x32xf32>
    %1 = vector.shape_cast %0 : vector<1x8x32xf32> to vector<8x32xf32>
    %c0_2 = arith.constant 0 : index
    %c0_3 = arith.constant 0 : index
    %2 = vector.load %arg2[%c0_2, %c0_3] : memref<1x32xf32, #tpu.memory_space<vmem>>, vector<1x32xf32>
    %c0_4 = arith.constant 0 : index
    %c0_5 = arith.constant 0 : index
    %3 = vector.load %arg3[%c0_4, %c0_5] : memref<1x32xf32, #tpu.memory_space<vmem>>, vector<1x32xf32>
    %cst = arith.constant dense<0.000000e+00> : vector<8xf32>
    %4 = vector.multi_reduction <add>, %1, %cst [1] : vector<8x32xf32> to vector<8xf32>
    %5 = vector.shape_cast %4 : vector<8xf32> to vector<8x1xf32>
    %cst_6 = arith.constant 3.200000e+01 : f32
    %6 = vector.broadcast %cst_6 : f32 to vector<8x1xf32>
    %7 = arith.divf %5, %6 : vector<8x1xf32>
    %8 = vector.broadcast %7 : vector<8x1xf32> to vector<8x32xf32>
    %9 = arith.subf %1, %8 : vector<8x32xf32>
    %10 = arith.mulf %9, %9 : vector<8x32xf32>
    %cst_7 = arith.constant dense<0.000000e+00> : vector<8xf32>
    %11 = vector.multi_reduction <add>, %10, %cst_7 [1] : vector<8x32xf32> to vector<8xf32>
    %12 = vector.shape_cast %11 : vector<8xf32> to vector<8x1xf32>
    %cst_8 = arith.constant 3.200000e+01 : f32
    %13 = vector.broadcast %cst_8 : f32 to vector<8x1xf32>
    %14 = arith.divf %12, %13 : vector<8x1xf32>
    %15 = vector.broadcast %7 : vector<8x1xf32> to vector<8x32xf32>
    %16 = arith.subf %1, %15 : vector<8x32xf32>
    %cst_9 = arith.constant 9.99999974E-6 : f32
    %17 = vector.broadcast %cst_9 : f32 to vector<8x1xf32>
    %18 = arith.addf %14, %17 : vector<8x1xf32>
    %19 = math.rsqrt %18 : vector<8x1xf32>
    %20 = vector.broadcast %19 : vector<8x1xf32> to vector<8x32xf32>
    %21 = arith.mulf %16, %20 : vector<8x32xf32>
    %22 = vector.broadcast %2 : vector<1x32xf32> to vector<8x32xf32>
    %23 = arith.mulf %21, %22 : vector<8x32xf32>
    %24 = vector.broadcast %3 : vector<1x32xf32> to vector<8x32xf32>
    %25 = arith.addf %23, %24 : vector<8x32xf32>
    %26 = arith.truncf %25 : vector<8x32xf32> to vector<8x32xbf16>
    %27 = vector.shape_cast %26 : vector<8x32xbf16> to vector<1x8x32xbf16>
    %28 = vector.shape_cast %27 : vector<1x8x32xbf16> to vector<1x8x32xbf16>
    %29 = vector.broadcast %28 : vector<1x8x32xbf16> to vector<4x8x32xbf16>
    %c0_10 = arith.constant 0 : index
    %c0_11 = arith.constant 0 : index
    %c0_12 = arith.constant 0 : index
    %30 = vector.load %arg4[%c0_10, %c0_11, %c0_12] : memref<4x32x8xbf16, #tpu.memory_space<vmem>>, vector<4x32x8xbf16>
    %cst_13 = arith.constant dense<0.000000e+00> : vector<4x8x8xf32>
    %31 = tpu.matmul %29, %30, %cst_13 {dimension_numbers = #tpu.dot_dimension_numbers<[2], [1], [1], [2], [0, 0, 0, 1, 1, 2], [0], [0]>} : vector<4x8x32xbf16>, vector<4x32x8xbf16>, vector<4x8x8xf32> -> vector<4x8x8xf32>
    %c0_14 = arith.constant 0 : index
    %c0_15 = arith.constant 0 : index
    %c0_16 = arith.constant 0 : index
    %32 = vector.load %arg7[%c0_14, %c0_15, %c0_16] : memref<4x1x8xf32, #tpu.memory_space<vmem>>, vector<4x1x8xf32>
    %33 = vector.broadcast %32 : vector<4x1x8xf32> to vector<4x8x8xf32>
    %34 = arith.addf %31, %33 : vector<4x8x8xf32>
    %c0_17 = arith.constant 0 : index
    %c0_18 = arith.constant 0 : index
    %c0_19 = arith.constant 0 : index
    %35 = vector.load %arg5[%c0_17, %c0_18, %c0_19] : memref<4x32x8xbf16, #tpu.memory_space<vmem>>, vector<4x32x8xbf16>
    %cst_20 = arith.constant dense<0.000000e+00> : vector<4x8x8xf32>
    %36 = tpu.matmul %29, %35, %cst_20 {dimension_numbers = #tpu.dot_dimension_numbers<[2], [1], [1], [2], [0, 0, 0, 1, 1, 2], [0], [0]>} : vector<4x8x32xbf16>, vector<4x32x8xbf16>, vector<4x8x8xf32> -> vector<4x8x8xf32>
    %c0_21 = arith.constant 0 : index
    %c0_22 = arith.constant 0 : index
    %c0_23 = arith.constant 0 : index
    %37 = vector.load %arg8[%c0_21, %c0_22, %c0_23] : memref<4x1x8xf32, #tpu.memory_space<vmem>>, vector<4x1x8xf32>
    %38 = vector.broadcast %37 : vector<4x1x8xf32> to vector<4x8x8xf32>
    %39 = arith.addf %36, %38 : vector<4x8x8xf32>
    %c0_24 = arith.constant 0 : index
    %c0_25 = arith.constant 0 : index
    %c0_26 = arith.constant 0 : index
    %40 = vector.load %arg6[%c0_24, %c0_25, %c0_26] : memref<4x32x8xbf16, #tpu.memory_space<vmem>>, vector<4x32x8xbf16>
    %cst_27 = arith.constant dense<0.000000e+00> : vector<4x8x8xf32>
    %41 = tpu.matmul %29, %40, %cst_27 {dimension_numbers = #tpu.dot_dimension_numbers<[2], [1], [1], [2], [0, 0, 0, 1, 1, 2], [0], [0]>} : vector<4x8x32xbf16>, vector<4x32x8xbf16>, vector<4x8x8xf32> -> vector<4x8x8xf32>
    %c0_28 = arith.constant 0 : index
    %c0_29 = arith.constant 0 : index
    %c0_30 = arith.constant 0 : index
    %42 = vector.load %arg9[%c0_28, %c0_29, %c0_30] : memref<4x1x8xf32, #tpu.memory_space<vmem>>, vector<4x1x8xf32>
    %43 = vector.broadcast %42 : vector<4x1x8xf32> to vector<4x8x8xf32>
    %44 = arith.addf %41, %43 : vector<4x8x8xf32>
    %45 = arith.truncf %34 : vector<4x8x8xf32> to vector<4x8x8xbf16>
    %46 = arith.truncf %39 : vector<4x8x8xf32> to vector<4x8x8xbf16>
    %cst_31 = arith.constant dense<0.000000e+00> : vector<4x8x8xf32>
    %47 = tpu.matmul %45, %46, %cst_31 {dimension_numbers = #tpu.dot_dimension_numbers<[2], [2], [1], [1], [0, 0, 0, 1, 1, 1], [0], [0]>} : vector<4x8x8xbf16>, vector<4x8x8xbf16>, vector<4x8x8xf32> -> vector<4x8x8xf32>
    %48 = tpu.iota {dimensions = array<i32: 1>} : vector<4x8x8xi32>
    %49 = tpu.iota {dimensions = array<i32: 2>} : vector<4x8x8xi32>
    %50 = arith.cmpi sle, %49, %48 : vector<4x8x8xi32>
    %cst_32 = arith.constant -1.000000e+30 : f32
    %51 = vector.broadcast %cst_32 : f32 to vector<4x8x8xf32>
    %52 = arith.select %50, %47, %51 : vector<4x8x8xi1>, vector<4x8x8xf32>
    %cst_33 = arith.constant dense<0xFF800000> : vector<4x8xf32>
    %53 = vector.multi_reduction <maximumf>, %52, %cst_33 [2] : vector<4x8x8xf32> to vector<4x8xf32>
    %54 = vector.shape_cast %53 : vector<4x8xf32> to vector<4x8x1xf32>
    %55 = vector.broadcast %54 : vector<4x8x1xf32> to vector<4x8x8xf32>
    %56 = arith.subf %52, %55 : vector<4x8x8xf32>
    %57 = math.exp %56 : vector<4x8x8xf32>
    %cst_34 = arith.constant dense<0.000000e+00> : vector<4x8xf32>
    %58 = vector.multi_reduction <add>, %57, %cst_34 [2] : vector<4x8x8xf32> to vector<4x8xf32>
    %59 = vector.shape_cast %58 : vector<4x8xf32> to vector<4x8x1xf32>
    %60 = tpu.reciprocal %59 {approx = true} : vector<4x8x1xf32> -> vector<4x8x1xf32>
    %61 = vector.broadcast %60 : vector<4x8x1xf32> to vector<4x8x8xf32>
    %62 = arith.mulf %57, %61 : vector<4x8x8xf32>
    %63 = arith.truncf %62 : vector<4x8x8xf32> to vector<4x8x8xbf16>
    %64 = arith.truncf %44 : vector<4x8x8xf32> to vector<4x8x8xbf16>
    %cst_35 = arith.constant dense<0.000000e+00> : vector<4x8x8xf32>
    %65 = tpu.matmul %63, %64, %cst_35 {dimension_numbers = #tpu.dot_dimension_numbers<[2], [1], [1], [2], [0, 0, 0, 1, 1, 2], [0], [0]>} : vector<4x8x8xbf16>, vector<4x8x8xbf16>, vector<4x8x8xf32> -> vector<4x8x8xf32>
    %66 = arith.truncf %65 : vector<4x8x8xf32> to vector<4x8x8xbf16>
    %c0_36 = arith.constant 0 : index
    %c0_37 = arith.constant 0 : index
    %c0_38 = arith.constant 0 : index
    %67 = vector.load %arg10[%c0_36, %c0_37, %c0_38] : memref<4x8x32xbf16, #tpu.memory_space<vmem>>, vector<4x8x32xbf16>
    %cst_39 = arith.constant dense<0.000000e+00> : vector<4x8x32xf32>
    %68 = tpu.matmul %66, %67, %cst_39 {dimension_numbers = #tpu.dot_dimension_numbers<[2], [1], [1], [2], [0, 0, 0, 1, 1, 2], [0], [0]>} : vector<4x8x8xbf16>, vector<4x8x32xbf16>, vector<4x8x32xf32> -> vector<4x8x32xf32>
    %cst_40 = arith.constant dense<0.000000e+00> : vector<8x32xf32>
    %69 = vector.multi_reduction <add>, %68, %cst_40 [0] : vector<4x8x32xf32> to vector<8x32xf32>
    %70 = arith.addf %1, %69 : vector<8x32xf32>
    %c0_41 = arith.constant 0 : index
    %c0_42 = arith.constant 0 : index
    %71 = vector.load %arg11[%c0_41, %c0_42] : memref<1x32xf32, #tpu.memory_space<vmem>>, vector<1x32xf32>
    %72 = vector.broadcast %71 : vector<1x32xf32> to vector<8x32xf32>
    %73 = arith.addf %70, %72 : vector<8x32xf32>
    %c0_43 = arith.constant 0 : index
    %c0_44 = arith.constant 0 : index
    %74 = vector.load %arg12[%c0_43, %c0_44] : memref<1x32xf32, #tpu.memory_space<vmem>>, vector<1x32xf32>
    %c0_45 = arith.constant 0 : index
    %c0_46 = arith.constant 0 : index
    %75 = vector.load %arg13[%c0_45, %c0_46] : memref<1x32xf32, #tpu.memory_space<vmem>>, vector<1x32xf32>
    %cst_47 = arith.constant dense<0.000000e+00> : vector<8xf32>
    %76 = vector.multi_reduction <add>, %73, %cst_47 [1] : vector<8x32xf32> to vector<8xf32>
    %77 = vector.shape_cast %76 : vector<8xf32> to vector<8x1xf32>
    %cst_48 = arith.constant 3.200000e+01 : f32
    %78 = vector.broadcast %cst_48 : f32 to vector<8x1xf32>
    %79 = arith.divf %77, %78 : vector<8x1xf32>
    %80 = vector.broadcast %79 : vector<8x1xf32> to vector<8x32xf32>
    %81 = arith.subf %73, %80 : vector<8x32xf32>
    %82 = arith.mulf %81, %81 : vector<8x32xf32>
    %cst_49 = arith.constant dense<0.000000e+00> : vector<8xf32>
    %83 = vector.multi_reduction <add>, %82, %cst_49 [1] : vector<8x32xf32> to vector<8xf32>
    %84 = vector.shape_cast %83 : vector<8xf32> to vector<8x1xf32>
    %cst_50 = arith.constant 3.200000e+01 : f32
    %85 = vector.broadcast %cst_50 : f32 to vector<8x1xf32>
    %86 = arith.divf %84, %85 : vector<8x1xf32>
    %87 = vector.broadcast %79 : vector<8x1xf32> to vector<8x32xf32>
    %88 = arith.subf %73, %87 : vector<8x32xf32>
    %cst_51 = arith.constant 9.99999974E-6 : f32
    %89 = vector.broadcast %cst_51 : f32 to vector<8x1xf32>
    %90 = arith.addf %86, %89 : vector<8x1xf32>
    %91 = math.rsqrt %90 : vector<8x1xf32>
    %92 = vector.broadcast %91 : vector<8x1xf32> to vector<8x32xf32>
    %93 = arith.mulf %88, %92 : vector<8x32xf32>
    %94 = vector.broadcast %74 : vector<1x32xf32> to vector<8x32xf32>
    %95 = arith.mulf %93, %94 : vector<8x32xf32>
    %96 = vector.broadcast %75 : vector<1x32xf32> to vector<8x32xf32>
    %97 = arith.addf %95, %96 : vector<8x32xf32>
    %98 = arith.truncf %97 : vector<8x32xf32> to vector<8x32xbf16>
    %c0_52 = arith.constant 0 : index
    %c0_53 = arith.constant 0 : index
    %99 = vector.load %arg14[%c0_52, %c0_53] : memref<32x128xbf16, #tpu.memory_space<vmem>>, vector<32x128xbf16>
    %cst_54 = arith.constant dense<0.000000e+00> : vector<8x128xf32>
    %100 = tpu.matmul %98, %99, %cst_54 {dimension_numbers = #tpu.dot_dimension_numbers<[1], [0], [0], [1], [0, 0, 1, 1], [], []>} : vector<8x32xbf16>, vector<32x128xbf16>, vector<8x128xf32> -> vector<8x128xf32>
    %c0_55 = arith.constant 0 : index
    %c0_56 = arith.constant 0 : index
    %101 = vector.load %arg15[%c0_55, %c0_56] : memref<1x128xf32, #tpu.memory_space<vmem>>, vector<1x128xf32>
    %102 = vector.broadcast %101 : vector<1x128xf32> to vector<8x128xf32>
    %103 = arith.addf %100, %102 : vector<8x128xf32>
    %cst_57 = arith.constant 5.000000e-01 : f32
    %104 = vector.broadcast %cst_57 : f32 to vector<8x128xf32>
    %105 = arith.mulf %104, %103 : vector<8x128xf32>
    %cst_58 = arith.constant 4.471500e-02 : f32
    %106 = vector.broadcast %cst_58 : f32 to vector<8x128xf32>
    %107 = arith.mulf %106, %103 : vector<8x128xf32>
    %108 = arith.mulf %107, %103 : vector<8x128xf32>
    %109 = arith.mulf %108, %103 : vector<8x128xf32>
    %110 = arith.addf %103, %109 : vector<8x128xf32>
    %cst_59 = arith.constant 0.797884583 : f32
    %111 = vector.broadcast %cst_59 : f32 to vector<8x128xf32>
    %112 = arith.mulf %111, %110 : vector<8x128xf32>
    %113 = math.tanh %112 : vector<8x128xf32>
    %cst_60 = arith.constant 1.000000e+00 : f32
    %114 = vector.broadcast %cst_60 : f32 to vector<8x128xf32>
    %115 = arith.addf %114, %113 : vector<8x128xf32>
    %116 = arith.mulf %105, %115 : vector<8x128xf32>
    %117 = arith.truncf %116 : vector<8x128xf32> to vector<8x128xbf16>
    %c0_61 = arith.constant 0 : index
    %c0_62 = arith.constant 0 : index
    %118 = vector.load %arg16[%c0_61, %c0_62] : memref<128x32xbf16, #tpu.memory_space<vmem>>, vector<128x32xbf16>
    %cst_63 = arith.constant dense<0.000000e+00> : vector<8x32xf32>
    %119 = tpu.matmul %117, %118, %cst_63 {dimension_numbers = #tpu.dot_dimension_numbers<[1], [0], [0], [1], [0, 0, 1, 1], [], []>} : vector<8x128xbf16>, vector<128x32xbf16>, vector<8x32xf32> -> vector<8x32xf32>
    %c0_64 = arith.constant 0 : index
    %c0_65 = arith.constant 0 : index
    %120 = vector.load %arg17[%c0_64, %c0_65] : memref<1x32xf32, #tpu.memory_space<vmem>>, vector<1x32xf32>
    %121 = vector.broadcast %120 : vector<1x32xf32> to vector<8x32xf32>
    %122 = arith.addf %119, %121 : vector<8x32xf32>
    %123 = arith.addf %73, %122 : vector<8x32xf32>
    %c0_66 = arith.constant 0 : index
    %c0_67 = arith.constant 0 : index
    %c0_68 = arith.constant 0 : index
    %124 = vector.load %arg18[%c0_66, %c0_67, %c0_68] : memref<1x8x32xf32, #tpu.memory_space<vmem>>, vector<1x8x32xf32>
    %125 = vector.shape_cast %124 : vector<1x8x32xf32> to vector<8x32xf32>
    %126 = vector.shape_cast %123 : vector<8x32xf32> to vector<1x8x32xf32>
    tpu.vector_store %arg18[%c0_66, %c0_67, %c0_68], %126 {strides = array<i32>} : memref<1x8x32xf32, #tpu.memory_space<vmem>>, vector<1x8x32xf32>,
    return
  }
  func.func @transform_0(%arg0: i32) -> (i32, i32, i32) {
    %c0_i32 = arith.constant 0 : i32
    %c0_i32_0 = arith.constant 0 : i32
    %c0_i32_1 = arith.constant 0 : i32
    return %arg0, %c0_i32, %c0_i32_0 : i32, i32, i32
  }
  func.func @transform_1(%arg0: i32) -> (i32, i32) {
    %c0_i32 = arith.constant 0 : i32
    %c0_i32_0 = arith.constant 0 : i32
    %c0_i32_1 = arith.constant 0 : i32
    return %c0_i32, %c0_i32_0 : i32, i32
  }
  func.func @transform_2(%arg0: i32) -> (i32, i32) {
    %c0_i32 = arith.constant 0 : i32
    %c0_i32_0 = arith.constant 0 : i32
    %c0_i32_1 = arith.constant 0 : i32
    return %c0_i32, %c0_i32_0 : i32, i32
  }
  func.func @transform_3(%arg0: i32) -> (i32, i32, i32) {
    %c0_i32 = arith.constant 0 : i32
    %c0_i32_0 = arith.constant 0 : i32
    %c0_i32_1 = arith.constant 0 : i32
    %c0_i32_2 = arith.constant 0 : i32
    return %c0_i32, %c0_i32_0, %c0_i32_1 : i32, i32, i32
  }
  func.func @transform_4(%arg0: i32) -> (i32, i32, i32) {
    %c0_i32 = arith.constant 0 : i32
    %c0_i32_0 = arith.constant 0 : i32
    %c0_i32_1 = arith.constant 0 : i32
    %c0_i32_2 = arith.constant 0 : i32
    return %c0_i32, %c0_i32_0, %c0_i32_1 : i32, i32, i32
  }
  func.func @transform_5(%arg0: i32) -> (i32, i32, i32) {
    %c0_i32 = arith.constant 0 : i32
    %c0_i32_0 = arith.constant 0 : i32
    %c0_i32_1 = arith.constant 0 : i32
    %c0_i32_2 = arith.constant 0 : i32
    return %c0_i32, %c0_i32_0, %c0_i32_1 : i32, i32, i32
  }
  func.func @transform_6(%arg0: i32) -> (i32, i32, i32) {
    %c0_i32 = arith.constant 0 : i32
    %c0_i32_0 = arith.constant 0 : i32
    %c0_i32_1 = arith.constant 0 : i32
    %c0_i32_2 = arith.constant 0 : i32
    return %c0_i32, %c0_i32_0, %c0_i32_1 : i32, i32, i32
  }
  func.func @transform_7(%arg0: i32) -> (i32, i32, i32) {
    %c0_i32 = arith.constant 0 : i32
    %c0_i32_0 = arith.constant 0 : i32
    %c0_i32_1 = arith.constant 0 : i32
    %c0_i32_2 = arith.constant 0 : i32
    return %c0_i32, %c0_i32_0, %c0_i32_1 : i32, i32, i32
  }
  func.func @transform_8(%arg0: i32) -> (i32, i32, i32) {
    %c0_i32 = arith.constant 0 : i32
    %c0_i32_0 = arith.constant 0 : i32
    %c0_i32_1 = arith.constant 0 : i32
    %c0_i32_2 = arith.constant 0 : i32
    return %c0_i32, %c0_i32_0, %c0_i32_1 : i32, i32, i32
  }
  func.func @transform_9(%arg0: i32) -> (i32, i32, i32) {
    %c0_i32 = arith.constant 0 : i32
    %c0_i32_0 = arith.constant 0 : i32
    %c0_i32_1 = arith.constant 0 : i32
    %c0_i32_2 = arith.constant 0 : i32
    return %c0_i32, %c0_i32_0, %c0_i32_1 : i32, i32, i32
  }
  func.func @transform_10(%arg0: i32) -> (i32, i32) {
    %c0_i32 = arith.constant 0 : i32
    %c0_i32_0 = arith.constant 0 : i32
    %c0_i32_1 = arith.constant 0 : i32
    return %c0_i32, %c0_i32_0 : i32, i32
  }
  func.func @transform_11(%arg0: i32) -> (i32, i32) {
    %c0_i32 = arith.constant 0 : i32
    %c0_i32_0 = arith.constant 0 : i32
    %c0_i32_1 = arith.constant 0 : i32
    return %c0_i32, %c0_i32_0 : i32, i32
  }
  func.func @transform_12(%arg0: i32) -> (i32, i32) {
    %c0_i32 = arith.constant 0 : i32
    %c0_i32_0 = arith.constant 0 : i32
    %c0_i32_1 = arith.constant 0 : i32
    return %c0_i32, %c0_i32_0 : i32, i32
  }
  func.func @transform_13(%arg0: i32) -> (i32, i32) {
    %c0_i32 = arith.constant 0 : i32
    %c0_i32_0 = arith.constant 0 : i32
    %c0_i32_1 = arith.constant 0 : i32
    return %c0_i32, %c0_i32_0 : i32, i32
  }
  func.func @transform_14(%arg0: i32) -> (i32, i32) {
    %c0_i32 = arith.constant 0 : i32
    %c0_i32_0 = arith.constant 0 : i32
    %c0_i32_1 = arith.constant 0 : i32
    return %c0_i32, %c0_i32_0 : i32, i32
  }
  func.func @transform_15(%arg0: i32) -> (i32, i32) {
    %c0_i32 = arith.constant 0 : i32
    %c0_i32_0 = arith.constant 0 : i32
    %c0_i32_1 = arith.constant 0 : i32
    return %c0_i32, %c0_i32_0 : i32, i32
  }
  func.func @transform_16(%arg0: i32) -> (i32, i32) {
    %c0_i32 = arith.constant 0 : i32
    %c0_i32_0 = arith.constant 0 : i32
    %c0_i32_1 = arith.constant 0 : i32
    return %c0_i32, %c0_i32_0 : i32, i32
  }
  func.func @transform_17(%arg0: i32) -> (i32, i32, i32) {
    %c0_i32 = arith.constant 0 : i32
    %c0_i32_0 = arith.constant 0 : i32
    %c0_i32_1 = arith.constant 0 : i32
    return %arg0, %c0_i32, %c0_i32_0 : i32, i32, i32
  }
}

</mosaic_0001>

<bundles_post_ra>
// kernel: tabular_baseline_forward.2
= control target key start
LH: loop header
LB: loop body
LE: loop exit
PB: predicated region body
PF: predicated region fallthrough
CT: control target
= control target key end

     0   :  { %s2777_s24 = smov 0   ;;  %s3157_s0 = inlined_call_operand.vmem [shape: f32[2,8,32], index: 0, kind: input, shape index: {}]   ;;  %s3158_s1 = inlined_call_operand.vmem [shape: f32[1,32], index: 1, kind: input, shape index: {}]   ;;  %s3159_s2 = inlined_call_operand.vmem [shape: f32[1,32], index: 2, kind: input, shape index: {}]   ;;  %s3160_s3 = inlined_call_operand.vmem [shape: bf16[4,32,8], index: 3, kind: input, shape index: {}]   ;;  %s3161_s4 = inlined_call_operand.vmem [shape: bf16[4,32,8], index: 4, kind: input, shape index: {}]   ;;  %s3162_s5 = inlined_call_operand.vmem [shape: bf16[4,32,8], index: 5, kind: input, shape index: {}]   ;;  %s3163_s6 = inlined_call_operand.vmem [shape: f32[4,1,8], index: 6, kind: input, shape index: {}]   ;;  %s3164_s7 = inlined_call_operand.vmem [shape: f32[4,1,8], index: 7, kind: input, shape index: {}]   ;;  %s3165_s8 = inlined_call_operand.vmem [shape: f32[4,1,8], index: 8, kind: input, shape index: {}]   ;;  %s3166_s9 = inlined_call_operand.vmem [shape: bf16[4,8,32], index: 9, kind: input, shape index: {}]   ;;  %s3167_s10 = inlined_call_operand.vmem [shape: f32[1,32], index: 10, kind: input, shape index: {}]   ;;  %s3168_s11 = inlined_call_operand.vmem [shape: f32[1,32], index: 11, kind: input, shape index: {}]   ;;  %s3169_s12 = inlined_call_operand.vmem [shape: f32[1,32], index: 12, kind: input, shape index: {}]   ;;  %s3170_s13 = inlined_call_operand.vmem [shape: bf16[32,128], index: 13, kind: input, shape index: {}]   ;;  %s3171_s14 = inlined_call_operand.vmem [shape: f32[1,128], index: 14, kind: input, shape index: {}]   ;;  %s3172_s15 = inlined_call_operand.vmem [shape: bf16[128,32], index: 15, kind: input, shape index: {}]   ;;  %s3173_s16 = inlined_call_operand.vmem [shape: f32[1,32], index: 16, kind: input, shape index: {}]   ;;  %s3174_s17 = inlined_call_operand.vmem [shape: f32[2,8,32], index: 17, kind: output, shape index: {}]  }
   0x1   :  { %3175 = sst [smem:[#allocation2_spill]] %s3157_s0 }
   0x2   :  { %3176 = sst [smem:[#allocation3_spill]] %s3158_s1 }
   0x3 LB: > { %s2256_s25 = sadd.s32 4294967295, %s2683_s24   ;;  %p2260_p0 = scmp.ge.s32.totalorder %s2683_s24, 1  ;;  %s2683_s24 = sphi %s2777_s24, %s27_s24  }
   0x4   : > { %p486_p1 = scmp.lt.s32.totalorder %s2683_s24, 3 }
   0x6   : > { %p487_p2 = pnand %p2260_p0, %p486_p1 }
   0x7   : > { %p536_p3 = scmp.lt.s32.totalorder (!%p487_p2), %s2256_s25, 1  ;;  %vm548_vm0 = vcmask (!%p487_p2), 261120   ;;  %s3177_s29 = sld [smem:[#allocation2_spill]] (!%p487_p2)  ;;  %v2621_v7 = vld [vmem:[%s3160_s3] sm:$0xff] (!%p487_p2)   ;;  %v2622_v8 = vld [vmem:[%s3160_s3 + $0x30] sm:$0xff] (!%p487_p2)   ;;  %v2685_v9 = vmov (!%p487_p2), 0.0  }
   0x8   : > { %490 = sbr.rel (%p487_p2) target bundleno = 2329 (0x919), region = 88  ;;  %2415 = vmatprep.subr.bf16.mxu0 (!%p487_p2), %v2685_v9  ;;  %2439 = vmatprep.subr.bf16.mxu1 (!%p487_p2), %v2685_v9  ;;  %v2623_v10 = vld [vmem:[%s3160_s3 + $0x8] sm:$0xff] (!%p487_p2)   ;;  %v2624_v11 = vld [vmem:[%s3160_s3 + $0x38] sm:$0xff] (!%p487_p2)   ;;  %vm2686_vm1 = vmmov (!%p487_p2), 0   ;;  %v2264_v18 = vld [vmem:[%s3159_s2] ss:$0 sm:$0xff] (!%p487_p2) }
   0x9   : > { %2416 = vmatpush3.bf16.msra.mxu0 (!%p487_p2), %v2621_v7  ;;  %2440 = vmatpush3.bf16.msra.mxu1 (!%p487_p2), %v2622_v8  ;;  %v2625_v21 = vld [vmem:[%s3160_s3 + $0x10] sm:$0xff] (!%p487_p2)   ;;  %v2627_v24 = vld [vmem:[%s3160_s3 + $0x18] sm:$0xff] (!%p487_p2)   ;;  %v2629_v26 = vld [vmem:[%s3160_s3 + $0x20] sm:$0xff] (!%p487_p2)   ;;  %vm1345_vm2 = vcmask (!%p487_p2), 64512   ;;  %vm1594_vm3 = vcmask (!%p487_p2), 1043456  }
   0xa   : > { %2417 = vmatprep.subr.bf16.mxu0 (!%p487_p2), %v2685_v9  ;;  %2441 = vmatprep.subr.bf16.mxu1 (!%p487_p2), %v2685_v9  ;;  %v2626_v22 = vld [vmem:[%s3161_s4 + $0x10] sm:$0xff] (!%p487_p2)   ;;  %v2628_v25 = vld [vmem:[%s3161_s4 + $0x18] sm:$0xff] (!%p487_p2)   ;;  %v2631_v28 = vld [vmem:[%s3160_s3 + $0x28] sm:$0xff] (!%p487_p2)  }
   0xb   : > { %2419 = vmatprep.mubr.msk.bf16.mxu0 (!%p487_p2), %vm2686_vm1, %v2685_v9  ;;  %2443 = vmatprep.mubr.msk.bf16.mxu1 (!%p487_p2), %vm2686_vm1, %v2685_v9  ;;  %v2630_v27 = vld [vmem:[%s3161_s4 + $0x30] sm:$0xff] (!%p487_p2)   ;;  %v2632_v29 = vld [vmem:[%s3161_s4 + $0x38] sm:$0xff] (!%p487_p2)   ;;  %v2633_v30 = vld [vmem:[%s3161_s4] sm:$0xff] (!%p487_p2)  }
   0xc   : > { %v2634_v31 = vld [vmem:[%s3162_s5 + $0x10] sm:$0xff] (!%p487_p2)   ;;  %v2635_v32 = vld [vmem:[%s3161_s4 + $0x8] sm:$0xff] (!%p487_p2)   ;;  %v2636_v33 = vld [vmem:[%s3162_s5 + $0x18] sm:$0xff] (!%p487_p2)  }
   0xd   : > { %2418 = vmatpush3.bf16.msra.mxu0 (!%p487_p2), %v2623_v10  ;;  %2442 = vmatpush3.bf16.msra.mxu1 (!%p487_p2), %v2624_v11  ;;  %v2637_v34 = vld [vmem:[%s3161_s4 + $0x20] sm:$0xff] (!%p487_p2)   ;;  %v2638_v35 = vld [vmem:[%s3162_s5 + $0x30] sm:$0xff] (!%p487_p2)   ;;  %v2639_v36 = vld [vmem:[%s3161_s4 + $0x28] sm:$0xff] (!%p487_p2)  }
   0xe   : > { %2423 = vmatprep.subr.bf16.mxu0 (!%p487_p2), %v2685_v9  ;;  %2455 = vmatprep.subr.bf16.mxu1 (!%p487_p2), %v2685_v9  ;;  %v2640_v37 = vld [vmem:[%s3162_s5 + $0x38] sm:$0xff] (!%p487_p2)   ;;  %v2641_v38 = vld [vmem:[%s3162_s5] sm:$0xff] (!%p487_p2)   ;;  %v2642_v39 = vld [vmem:[%s3162_s5 + $0x8] sm:$0xff] (!%p487_p2)  }
   0xf   : > { %s3180_s25 = smov (!%p536_p3, %s2256_s25), 1  ;;  %v2643_v40 = vld [vmem:[%s3162_s5 + $0x20] sm:$0xff]   ;;  %v2644_v41 = vld [vmem:[%s3162_s5 + $0x28] sm:$0xff]  }
  0x10   : > { %s2261_s26 = sshll.u32 %s3180_s25, 3  ;;  %v2282_v50 = vld [vmem:[%s3164_s7 + $0x1] ss:$0 sm:$0xff]  ;;  %v2284_v63 = vld [vmem:[%s3164_s7 + $0x3] ss:$0 sm:$0xff] }
  0x11   : > { %s539_s0 = scalar_lea.vmem %s3177_s29, %s2261_s26  ;;  %s3178_s29 = sld [smem:[#allocation3_spill]]  ;;  %v2266_v61 = vld [vmem:[%s3163_s6 + $0x1] ss:$0 sm:$0xff] }
  0x12   : > { %v2793_v0 = vld [vmem:[%s539_s0] sm:$0xff]  ;;  %s543_s28 = scalar_lea.vmem %s3174_s17, %s2261_s26 }
  0x13   : > { %v549_v1 = vsel %vm548_vm0, %v2793_v0, 0.0 }
  0x14   : > { %550 = vadd.xlane.f32.xlu0 %v549_v1 }
  0x17   : > { %v2263_v16 = vld [vmem:[%s3178_s29] ss:$0 sm:$0xff] }
  0xa1   : > { %v551_v2 = vpop.xlane.xlu0 %550 }
  0xa2   : > { %v553_v3 = vmul.f32 0.03125, %v551_v2 }
  0xa4   : > { %v554_v4 = vsub.f32 %v2793_v0, %v553_v3 }
  0xa6   : > { %v555_v5 = vmul.f32 %v554_v4, %v554_v4 }
  0xa8   : > { %v556_v6 = vsel %vm548_vm0, %v555_v5, 0.0 }
  0xa9   : > { %557 = vadd.xlane.f32.xlu0 %v556_v6 }
 0x136   : > { %v558_v12 = vpop.xlane.xlu0 %557 }
 0x137   : > { %v559_v13 = vmul.f32 0.03125, %v558_v12 }
 0x139   : > { %v560_v14 = vadd.f32 1e-05, %v559_v13 }
 0x13b   : > { %2655 = vrsqrt.f32 %v560_v14  ;;  %v2268_v14 = vld [vmem:[%s3163_s6 + $0x3] ss:$0 sm:$0xff] }
 0x145   : > { %v2656_v15 = vpop.eup %2655 }
 0x146   : > { %v562_v17 = vmul.f32 %v2656_v15, %v554_v4 }
 0x148   : > { %v569_v19 = vmul.f32 %v2263_v16, %v562_v17  ;;  %v2281_v16 = vld [vmem:[%s3164_s7] ss:$0 sm:$0xff]  ;;  %v2298_v17 = vld [vmem:[%s3165_s8 + $0x1] ss:$0 sm:$0xff] }
 0x14a   : > { %v576_v20 = vadd.f32 %v2264_v18, %v569_v19 }
 0x14c   : > { %v2833_v23 = vpack.c.bf16 %v576_v20, %v576_v20 }
 0x14e   : > { %2420 = vmatmul.mubr.msk.bf16.vlgmr.msra.gmra.mrb[0].mxu0 %vm548_vm0, %v2833_v23  ;;  %2444 = vmatmul.mubr.msk.bf16.vlgmr.msra.gmra.mrb[0].mxu1 %vm548_vm0, %v2833_v23 }
 0x14f   : > { %2424 = vmatpush3.bf16.msra.mxu0 %v2625_v21  ;;  %2456 = vmatpush3.bf16.msra.mxu1 %v2626_v22 }
 0x150   : > { %2425 = vmatprep.subr.bf16.mxu0 %v2685_v9  ;;  %2457 = vmatprep.subr.bf16.mxu1 %v2685_v9 }
 0x151   : > { %2427 = vmatprep.mubr.msk.bf16.mxu0 %vm2686_vm1, %v2685_v9  ;;  %2459 = vmatprep.mubr.msk.bf16.mxu1 %vm2686_vm1, %v2685_v9 }
 0x153   : > { %2426 = vmatpush3.bf16.msra.mxu0 %v2627_v24  ;;  %2458 = vmatpush3.bf16.msra.mxu1 %v2628_v25 }
 0x154   : > { %2431 = vmatprep.subr.bf16.mxu0 %v2685_v9  ;;  %2471 = vmatprep.subr.bf16.mxu1 %v2685_v9 }
 0x156   : > { %2428 = vmatmul.mubr.msk.bf16.vlgmr.msra.gmra.mrb[4].mxu0 %vm548_vm0, %v2833_v23  ;;  %2460 = vmatmul.mubr.msk.bf16.vlgmr.msra.gmra.mrb[4].mxu1 %vm548_vm0, %v2833_v23 }
 0x157   : > { %2432 = vmatpush3.bf16.msra.mxu0 %v2629_v26  ;;  %2472 = vmatpush3.bf16.msra.mxu1 %v2630_v27 }
 0x158   : > { %2433 = vmatprep.subr.bf16.mxu0 %v2685_v9  ;;  %2473 = vmatprep.subr.bf16.mxu1 %v2685_v9 }
 0x159   : > { %2435 = vmatprep.mubr.msk.bf16.mxu0 %vm2686_vm1, %v2685_v9  ;;  %2475 = vmatprep.mubr.msk.bf16.mxu1 %vm2686_vm1, %v2685_v9 }
 0x15b   : > { %2434 = vmatpush3.bf16.msra.mxu0 %v2631_v28  ;;  %2474 = vmatpush3.bf16.msra.mxu1 %v2632_v29 }
 0x15c   : > { %2447 = vmatprep.subr.bf16.mxu0 %v2685_v9  ;;  %2487 = vmatprep.subr.bf16.mxu1 %v2685_v9 }
 0x15e   : > { %2436 = vmatmul.mubr.msk.bf16.vlgmr.msra.gmra.mrb[8].mxu0 %vm548_vm0, %v2833_v23  ;;  %2476 = vmatmul.mubr.msk.bf16.vlgmr.msra.gmra.mrb[8].mxu1 %vm548_vm0, %v2833_v23 }
 0x15f   : > { %2448 = vmatpush3.bf16.msra.mxu0 %v2633_v30  ;;  %2488 = vmatpush3.bf16.msra.mxu1 %v2634_v31 }
 0x160   : > { %2449 = vmatprep.subr.bf16.mxu0 %v2685_v9  ;;  %2489 = vmatprep.subr.bf16.mxu1 %v2685_v9 }
 0x161   : > { %2451 = vmatprep.mubr.msk.bf16.mxu0 %vm2686_vm1, %v2685_v9  ;;  %2491 = vmatprep.mubr.msk.bf16.mxu1 %vm2686_vm1, %v2685_v9 }
 0x163   : > { %2450 = vmatpush3.bf16.msra.mxu0 %v2635_v32  ;;  %2490 = vmatpush3.bf16.msra.mxu1 %v2636_v33  ;;  %v2265_v32 = vld [vmem:[%s3163_s6] ss:$0 sm:$0xff] }
 0x164   : > { %2463 = vmatprep.subr.bf16.mxu0 %v2685_v9  ;;  %2503 = vmatprep.subr.bf16.mxu1 %v2685_v9 }
 0x166   : > { %2452 = vmatmul.mubr.msk.bf16.vlgmr.msra.gmra.mrb[12].mxu0 %vm548_vm0, %v2833_v23  ;;  %2492 = vmatmul.mubr.msk.bf16.vlgmr.msra.gmra.mrb[12].mxu1 %vm548_vm0, %v2833_v23 }
 0x167   : > { %2464 = vmatpush3.bf16.msra.mxu0 %v2637_v34  ;;  %2504 = vmatpush3.bf16.msra.mxu1 %v2638_v35  ;;  %v2283_v35 = vld [vmem:[%s3164_s7 + $0x2] ss:$0 sm:$0xff] }
 0x168   : > { %2465 = vmatprep.subr.bf16.mxu0 %v2685_v9  ;;  %2505 = vmatprep.subr.bf16.mxu1 %v2685_v9 }
 0x169   : > { %2467 = vmatprep.mubr.msk.bf16.mxu0 %vm2686_vm1, %v2685_v9  ;;  %2507 = vmatprep.mubr.msk.bf16.mxu1 %vm2686_vm1, %v2685_v9 }
 0x16b   : > { %2466 = vmatpush3.bf16.msra.mxu0 %v2639_v36  ;;  %2506 = vmatpush3.bf16.msra.mxu1 %v2640_v37 }
 0x16c   : > { %2479 = vmatprep.subr.bf16.mxu0 %v2685_v9  ;;  %2517 = vmatprep.subr.bf16.mxu1 %v2685_v9 }
 0x16e   : > { %2468 = vmatmul.mubr.msk.bf16.vlgmr.msra.gmra.mrb[16].mxu0 %vm548_vm0, %v2833_v23  ;;  %2508 = vmatmul.mubr.msk.bf16.vlgmr.msra.gmra.mrb[16].mxu1 %vm548_vm0, %v2833_v23 }
 0x16f   : > { %2480 = vmatpush3.bf16.msra.mxu0 %v2641_v38  ;;  %2483 = vmatprep.mubr.msk.bf16.mxu0 %vm2686_vm1, %v2685_v9 }
 0x170   : > { %2481 = vmatprep.subr.bf16.mxu0 %v2685_v9  ;;  %2519 = vmatprep.mubr.msk.bf16.mxu1 %vm2686_vm1, %v2685_v9 }
 0x173   : > { %2482 = vmatpush3.bf16.msra.mxu0 %v2642_v39 }
 0x174   : > { %2495 = vmatprep.subr.bf16.mxu0 %v2685_v9 }
 0x176   : > { %2484 = vmatmul.mubr.msk.bf16.vlgmr.msra.gmra.mrb[20].mxu0 %vm548_vm0, %v2833_v23 }
 0x177   : > { %2496 = vmatpush3.bf16.msra.mxu0 %v2643_v40  ;;  %2499 = vmatprep.mubr.msk.bf16.mxu0 %vm2686_vm1, %v2685_v9 }
 0x178   : > { %2497 = vmatprep.subr.bf16.mxu0 %v2685_v9 }
 0x17b   : > { %2498 = vmatpush3.bf16.msra.mxu0 %v2644_v41 }
 0x17c   : > { %2511 = vmatprep.subr.bf16.mxu0 %v2685_v9 }
 0x17e   : > { %2500 = vmatmul.mubr.msk.bf16.vlgmr.msra.gmra.mrb[24].mxu0 %vm548_vm0, %v2833_v23 }
 0x17f   : > { %2513 = vmatprep.mubr.msk.bf16.mxu0 %vm2686_vm1, %v2685_v9 }
 0x221   : > { %v2957_v42 = vpop.f32.mrb[0].mxu0  ;;  %v827_v43 = vpop.f32.mrb[0].mxu1 }
 0x222   : > { %v2421_v44 = vpop.f32.mrb[1].mxu0  ;;  %v2445_v45 = vpop.f32.mrb[1].mxu1  ;;  %v828_v18 = vadd.f32 %v2268_v14, %v827_v43  ;;  %v672_v36 = vadd.f32 %v2265_v32, %v2957_v42  ;;  %v2267_v42 = vld [vmem:[%s3163_s6 + $0x2] ss:$0 sm:$0xff] }
 0x223   : > { %v674_v46 = vpop.f32.mrb[2].mxu0  ;;  %v830_v47 = vpop.f32.mrb[2].mxu1 }
 0x224   : > { %v2422_v48 = vpop.f32.mrb[3].mxu0  ;;  %v2446_v49 = vpop.f32.mrb[3].mxu1  ;;  %v1340_v27 = vpack.c.bf16 %v828_v18, %v828_v18  ;;  %v1337_v45 = vpack.c.bf16 %v672_v36, %v672_v36 }
 0x229   : > { %v723_v51 = vpop.f32.mrb[4].mxu0  ;;  %v975_v52 = vpop.f32.mrb[4].mxu1 }
 0x22a   : > { %v976_v53 = vadd.f32 %v2282_v50, %v975_v52  ;;  %v2429_v54 = vpop.f32.mrb[5].mxu0  ;;  %v2461_v55 = vpop.f32.mrb[5].mxu1  ;;  %v724_v1 = vadd.f32 %v2266_v61, %v723_v51  ;;  %v2297_v50 = vld [vmem:[%s3165_s8] ss:$0 sm:$0xff] }
 0x22b   : > { %v726_v56 = vpop.f32.mrb[6].mxu0  ;;  %v978_v57 = vpop.f32.mrb[6].mxu1 }
 0x22c   : > { %v1342_v58 = vpack.c.bf16 %v976_v53, %v976_v53  ;;  %v2430_v59 = vpop.f32.mrb[7].mxu0  ;;  %v2462_v60 = vpop.f32.mrb[7].mxu1  ;;  %v1338_v10 = vpack.c.bf16 %v724_v1, %v724_v1 }
 0x22e   : > { %v1396_v62 = vsel %vm1345_vm2, %v1342_v58, 0 }
 0x22f   : > { %2518 = vmatpush3.bf16.xpose.msra.mxu1 %v1396_v62 }
 0x230   : > { %2529 = vmatprep.subr.bf16.mxu1 %v2685_v9 }
 0x231   : > { %v775_v2 = vpop.f32.mrb[8].mxu0  ;;  %v1079_v3 = vpop.f32.mrb[8].mxu1 }
 0x232   : > { %v1080_v4 = vadd.f32 %v2284_v63, %v1079_v3  ;;  %v2437_v5 = vpop.f32.mrb[9].mxu0  ;;  %v2477_v6 = vpop.f32.mrb[9].mxu1  ;;  %v776_v51 = vadd.f32 %v2267_v42, %v775_v2 }
 0x233   : > { %v778_v7 = vpop.f32.mrb[10].mxu0  ;;  %v1082_v8 = vpop.f32.mrb[10].mxu1  ;;  %v1530_v5 = vlaneseq }
 0x234   : > { %v1344_v11 = vpack.c.bf16 %v1080_v4, %v1080_v4  ;;  %v2438_v12 = vpop.f32.mrb[11].mxu0  ;;  %v2478_v13 = vpop.f32.mrb[11].mxu1  ;;  %v1339_v56 = vpack.c.bf16 %v776_v51, %v776_v51 }
 0x235   : > { %v1533_v12 = vand.u32 127, %v1530_v5 }
 0x236   : > { %v1488_v15 = vsel %vm1345_vm2, %v1344_v11, 0  ;;  %2520 = vmatmul.mubr.msk.bf16.vlgmr.msra.gmra.mrb[20].mxu1 %vm1345_vm2, %v1338_v10  ;;  %v1531_v11 = vshrl.u32 %v1530_v5, 7 }
 0x237   : > { %2530 = vmatpush3.bf16.xpose.msra.mxu1 %v1488_v15  ;;  %2531 = vmatprep.mubr.msk.bf16.mxu1 %vm2686_vm1, %v2685_v9 }
 0x238   : > { %2541 = vmatprep.subr.bf16.mxu1 %v2685_v9  ;;  %vm1534_vm4 = vcmp.le.s32.totalorder %v1533_v12, %v1531_v11 }
 0x239   : > { %v923_v19 = vpop.f32.mrb[12].mxu0  ;;  %v1227_v20 = vpop.f32.mrb[12].mxu1 }
 0x23a   : > { %v924_v21 = vadd.f32 %v2281_v16, %v923_v19  ;;  %v1228_v22 = vadd.f32 %v2298_v17, %v1227_v20  ;;  %v2453_v23 = vpop.f32.mrb[13].mxu0  ;;  %v2493_v24 = vpop.f32.mrb[13].mxu1 }
 0x23b   : > { %v926_v25 = vpop.f32.mrb[14].mxu0  ;;  %v1230_v26 = vpop.f32.mrb[14].mxu1 }
 0x23c   : > { %v1341_v28 = vpack.c.bf16 %v924_v21, %v924_v21  ;;  %v1588_v29 = vpack.c.bf16 %v1228_v22, %v1228_v22  ;;  %v2454_v30 = vpop.f32.mrb[15].mxu0  ;;  %v2494_v31 = vpop.f32.mrb[15].mxu1 }
 0x23e   : > { %v1350_v33 = vsel %vm1345_vm2, %v1341_v28, 0  ;;  %v1642_v34 = vsel %vm1594_vm3, %v1588_v29, 0  ;;  %2532 = vmatmul.mubr.msk.bf16.vlgmr.msra.gmra.mrb[24].mxu1 %vm1345_vm2, %v1340_v27 }
 0x23f   : > { %2512 = vmatpush3.bf16.xpose.msra.mxu0 %v1350_v33  ;;  %2542 = vmatpush3.bf16.msra.mxu1 %v1642_v34 }
 0x240   : > { %2523 = vmatprep.subr.bf16.mxu0 %v2685_v9  ;;  %2543 = vmatprep.mubr.msk.bf16.mxu1 %vm2686_vm1, %v2685_v9 }
 0x241   : > { %v1027_v37 = vpop.f32.mrb[16].mxu0  ;;  %v2997_v38 = vpop.f32.mrb[16].mxu1  ;;  %2553 = vmatprep.subr.bf16.mxu1 %v2685_v9 }
 0x242   : > { %v1028_v39 = vadd.f32 %v2283_v35, %v1027_v37  ;;  %v2469_v40 = vpop.f32.mrb[17].mxu0  ;;  %v2509_v41 = vpop.f32.mrb[17].mxu1 }
 0x243   : > { %v1030_v43 = vpop.f32.mrb[18].mxu0  ;;  %v1334_v44 = vpop.f32.mrb[18].mxu1 }
 0x244   : > { %v1343_v46 = vpack.c.bf16 %v1028_v39, %v1028_v39  ;;  %v2470_v47 = vpop.f32.mrb[19].mxu0  ;;  %v2510_v48 = vpop.f32.mrb[19].mxu1 }
 0x246   : > { %v1442_v49 = vsel %vm1345_vm2, %v1343_v46, 0  ;;  %2514 = vmatmul.mubr.msk.bf16.vlgmr.msra.gmra.mrb[28].mxu0 %vm1345_vm2, %v1337_v45 }
 0x247   : > { %2524 = vmatpush3.bf16.xpose.msra.mxu0 %v1442_v49  ;;  %2525 = vmatprep.mubr.msk.bf16.mxu0 %vm2686_vm1, %v2685_v9 }
 0x248   : > { %2535 = vmatprep.subr.bf16.mxu0 %v2685_v9 }
 0x249   : > { %v1175_v52 = vpop.f32.mrb[20].mxu0 }
 0x24a   : > { %v1176_v53 = vadd.f32 %v2297_v50, %v1175_v52  ;;  %v2485_v54 = vpop.f32.mrb[21].mxu0  ;;  %v2299_v52 = vld [vmem:[%s3165_s8 + $0x2] ss:$0 sm:$0xff] }
 0x24b   : > { %v1178_v55 = vpop.f32.mrb[22].mxu0 }
 0x24c   : > { %v1587_v57 = vpack.c.bf16 %v1176_v53, %v1176_v53  ;;  %v2486_v58 = vpop.f32.mrb[23].mxu0  ;;  %v2300_v55 = vld [vmem:[%s3165_s8 + $0x3] ss:$0 sm:$0xff] }
 0x24d   : > { %v1332_v58 = vadd.f32 %v2300_v55, %v2997_v38 }
 0x24e   : > { %v1596_v59 = vsel %vm1594_vm3, %v1587_v57, 0  ;;  %2526 = vmatmul.mubr.msk.bf16.vlgmr.msra.gmra.mrb[32].mxu0 %vm1345_vm2, %v1339_v56 }
 0x24f   : > { %2536 = vmatpush3.bf16.msra.mxu0 %v1596_v59  ;;  %2537 = vmatprep.mubr.msk.bf16.mxu0 %vm2686_vm1, %v2685_v9 }
 0x250   : > { %2547 = vmatprep.subr.bf16.mxu0 %v2685_v9 }
 0x251   : > { %v3016_v60 = vpop.f32.mrb[24].mxu0 }
 0x252   : > { %v2501_v61 = vpop.f32.mrb[25].mxu0  ;;  %v1280_v53 = vadd.f32 %v2299_v52, %v3016_v60 }
 0x253   : > { %v1282_v62 = vpop.f32.mrb[26].mxu0 }
 0x254   : > { %v2502_v63 = vpop.f32.mrb[27].mxu0  ;;  %v1589_v59 = vpack.c.bf16 %v1280_v53, %v1280_v53 }
 0x309   : > { %v1432_v1 = vpop.f32.mrb[20].mxu1 }
 0x30a   : > { %v2521_v2 = vpop.f32.mrb[21].mxu1  ;;  %v1536_v18 = vsel %vm1534_vm4, %v1432_v1, -1e+30  ;;  %v1590_v1 = vpack.c.bf16 %v1332_v58, %v1332_v58 }
 0x30b   : > { %v1435_v3 = vpop.f32.mrb[22].mxu1  ;;  %v1542_v20 = vsel %vm1345_vm2, %v1536_v18, -inf  ;;  %v1688_v2 = vsel %vm1594_vm3, %v1589_v59, 0 }
 0x30c   : > { %v2522_v4 = vpop.f32.mrb[23].mxu1  ;;  %v1734_v38 = vsel %vm1594_vm3, %v1590_v1, 0  ;;  %v2325_v1 = vld [vmem:[%s3167_s10] ss:$0 sm:$0xff] }
 0x311   : > { %v1524_v6 = vpop.f32.mrb[24].mxu1 }
 0x312   : > { %v2533_v7 = vpop.f32.mrb[25].mxu1  ;;  %v1538_v21 = vsel %vm1534_vm4, %v1524_v6, -1e+30  ;;  %v1780_v6 = vld [vmem:[%s3166_s9] sm:$0xf] }
 0x313   : > { %v1527_v8 = vpop.f32.mrb[26].mxu1  ;;  %v1548_v26 = vsel %vm1345_vm2, %v1538_v21, -inf  ;;  %v1788_v11 = vsel %vm1594_vm3, %v1780_v6, 0 }
 0x314   : > { %v2534_v10 = vpop.f32.mrb[27].mxu1 }
 0x319   : > { %v1386_v13 = vpop.f32.mrb[28].mxu0 }
 0x31a   : > { %v1535_v14 = vsel %vm1534_vm4, %v1386_v13, -1e+30  ;;  %v2515_v15 = vpop.f32.mrb[29].mxu0  ;;  %v1781_v13 = vld [vmem:[%s3166_s9 + $0x4] sm:$0xf] }
 0x31b   : > { %v1389_v16 = vpop.f32.mrb[30].mxu0  ;;  %v1539_v17 = vsel %vm1345_vm2, %v1535_v14, -inf  ;;  %v1782_v15 = vld [vmem:[%s3166_s9 + $0x8] sm:$0xf] }
 0x31c   : > { %1540 = vmax.xlane.f32.xlu1 %v1539_v17  ;;  %v2516_v19 = vpop.f32.mrb[31].mxu0 }
 0x31d   : > { %v1880_v19 = vsel %vm1594_vm3, %v1782_v15, 0  ;;  %v2326_v15 = vld [vmem:[%s3168_s11] ss:$0 sm:$0xff] }
 0x320   : > { %1543 = vmax.xlane.f32.xlu1 %v1542_v20 }
 0x321   : > { %v1478_v22 = vpop.f32.mrb[32].mxu0 }
 0x322   : > { %v1537_v23 = vsel %vm1534_vm4, %v1478_v22, -1e+30  ;;  %v2527_v24 = vpop.f32.mrb[33].mxu0 }
 0x323   : > { %v1481_v25 = vpop.f32.mrb[34].mxu0  ;;  %v1545_v27 = vsel %vm1345_vm2, %v1537_v23, -inf }
 0x324   : > { %1549 = vmax.xlane.f32.xlu1 %v1548_v26  ;;  %1546 = vmax.xlane.f32.xlu0 %v1545_v27  ;;  %v2528_v28 = vpop.f32.mrb[35].mxu0 }
 0x3a9   : > { %v1541_v29 = vpop.xlane.xlu1 %1540 }
 0x3aa   : > { %v1551_v30 = vsub.f32 %v1535_v14, %v1541_v29  ;;  %v1834_v14 = vsel %vm1594_vm3, %v1781_v13, 0 }
 0x3ac   : > { %v1555_v31 = vmul.f32 1.442695, %v1551_v30 }
 0x3ad   : > { %v1544_v32 = vpop.xlane.xlu1 %1543 }
 0x3ae   : > { %2657 = vpow2.f32 %v1555_v31  ;;  %v1552_v33 = vsub.f32 %v1536_v18, %v1544_v32 }
 0x3b0   : > { %v1557_v34 = vmul.f32 1.442695, %v1552_v33 }
 0x3b1   : > { %v1550_v35 = vpop.xlane.xlu1 %1549  ;;  %v1547_v36 = vpop.xlane.xlu0 %1546 }
 0x3b2   : > { %2659 = vpow2.f32 %v1557_v34  ;;  %v1554_v37 = vsub.f32 %v1538_v21, %v1550_v35  ;;  %v1553_v39 = vsub.f32 %v1537_v23, %v1547_v36  ;;  %v1783_v21 = vld [vmem:[%s3166_s9 + $0xc] sm:$0xf] }
 0x3b3   : > { %v1926_v26 = vsel %vm1594_vm3, %v1783_v21, 0  ;;  %v2648_v21 = vld [vmem:[%s3172_s15 + $0x8] sm:$0xff]  }
 0x3b4   : > { %v1561_v40 = vmul.f32 1.442695, %v1554_v37  ;;  %v1559_v41 = vmul.f32 1.442695, %v1553_v39 }
 0x3b6   : > { %2661 = vpow2.f32 %v1561_v40 }
 0x3b7   : > { %2663 = vpow2.f32 %v1559_v41 }
 0x3b8   : > { %v2658_v43 = vpop.eup %2657 }
 0x3b9   : > { %v1563_v44 = vsel %vm1345_vm2, %v2658_v43, 0.0 }
 0x3ba   : > { %1564 = vadd.xlane.f32.xlu0 %v1563_v44 }
 0x3bc   : > { %v2660_v45 = vpop.eup %2659 }
 0x3bd   : > { %v1566_v46 = vsel %vm1345_vm2, %v2660_v45, 0.0 }
 0x3be   : > { %1567 = vadd.xlane.f32.xlu1 %v1566_v46 }
 0x3c0   : > { %v2662_v47 = vpop.eup %2661 }
 0x3c1   : > { %v2664_v48 = vpop.eup %2663  ;;  %v1572_v42 = vsel %vm1345_vm2, %v2662_v47, 0.0 }
 0x3c2   : > { %1573 = vadd.xlane.f32.xlu1 %v1572_v42  ;;  %v1569_v49 = vsel %vm1345_vm2, %v2664_v48, 0.0 }
 0x3c3   : > { %1570 = vadd.xlane.f32.xlu0 %v1569_v49 }
 0x447   : > { %v1565_v50 = vpop.xlane.xlu0 %1564 }
 0x448   : > { %2665 = vrcp.f32 %v1565_v50 }
 0x44b   : > { %v1568_v51 = vpop.xlane.xlu1 %1567 }
 0x44c   : > { %2667 = vrcp.f32 %v1568_v51 }
 0x44f   : > { %v1574_v54 = vpop.xlane.xlu1 %1573 }
 0x450   : > { %2669 = vrcp.f32 %v1574_v54  ;;  %v1571_v56 = vpop.xlane.xlu0 %1570 }
 0x451   : > { %2671 = vrcp.f32 %v1571_v56 }
 0x452   : > { %v2666_v57 = vpop.eup %2665 }
 0x453   : > { %v1579_v61 = vmul.f32 %v2666_v57, %v2658_v43 }
 0x455   : > { %v1583_v62 = vpack.c.bf16 %v1579_v61, %v1579_v61 }
 0x456   : > { %v2668_v63 = vpop.eup %2667 }
 0x457   : > { %v1580_v3 = vmul.f32 %v2668_v63, %v2660_v45  ;;  %2538 = vmatmul.mubr.msk.bf16.vlgmr.msra.gmra.mrb[36].mxu0 %vm1345_vm2, %v1583_v62 }
 0x458   : > { %2548 = vmatpush3.bf16.msra.mxu0 %v1688_v2  ;;  %2549 = vmatprep.mubr.msk.bf16.mxu0 %vm2686_vm1, %v2685_v9 }
 0x459   : > { %v1584_v60 = vpack.c.bf16 %v1580_v3, %v1580_v3  ;;  %2559 = vmatprep.subr.bf16.mxu0 %v2685_v9 }
 0x45a   : > { %v2670_v4 = vpop.eup %2669 }
 0x45b   : > { %v2672_v5 = vpop.eup %2671  ;;  %2544 = vmatmul.mubr.msk.bf16.vlgmr.msra.gmra.mrb[28].mxu1 %vm1345_vm2, %v1584_v60  ;;  %v1582_v8 = vmul.f32 %v2670_v4, %v2662_v47 }
 0x45c   : > { %v1581_v7 = vmul.f32 %v2672_v5, %v2664_v48  ;;  %2554 = vmatpush3.bf16.msra.mxu1 %v1734_v38  ;;  %2555 = vmatprep.mubr.msk.bf16.mxu1 %vm2686_vm1, %v2685_v9 }
 0x45d   : > { %2565 = vmatprep.subr.bf16.mxu1 %v2685_v9  ;;  %v1586_v12 = vpack.c.bf16 %v1582_v8, %v1582_v8  ;;  %v2645_v8 = vld [vmem:[%s3170_s13] sm:$0xff]  }
 0x45e   : > { %v1585_v10 = vpack.c.bf16 %v1581_v7, %v1581_v7 }
 0x460   : > { %2550 = vmatmul.mubr.msk.bf16.vlgmr.msra.gmra.mrb[40].mxu0 %vm1345_vm2, %v1585_v10  ;;  %v2647_v10 = vld [vmem:[%s3172_s15] sm:$0xff]  }
 0x461   : > { %2560 = vmatpush3.bf16.msra.mxu0 %v1788_v11  ;;  %2561 = vmatprep.mubr.msk.bf16.mxu0 %vm2686_vm1, %v2685_v9 }
 0x462   : > { %2571 = vmatprep.subr.bf16.mxu0 %v2685_v9 }
 0x463   : > { %2556 = vmatmul.mubr.msk.bf16.vlgmr.msra.gmra.mrb[32].mxu1 %vm1345_vm2, %v1586_v12 }
 0x464   : > { %2567 = vmatprep.mubr.msk.bf16.mxu1 %vm2686_vm1, %v2685_v9  ;;  %2566 = vmatpush3.bf16.msra.mxu1 %v1834_v14 }
 0x465   : > { %2577 = vmatprep.subr.bf16.mxu1 %v2685_v9 }
 0x52a   : > { %v1632_v16 = vpop.f32.mrb[36].mxu0 }
 0x52b   : > { %v1776_v17 = vpack.c.bf16 %v1632_v16, %v1632_v16  ;;  %v2539_v18 = vpop.f32.mrb[37].mxu0 }
 0x52c   : > { %v1635_v20 = vpop.f32.mrb[38].mxu0 }
 0x52d   : > { %v2540_v22 = vpop.f32.mrb[39].mxu0  ;;  %2562 = vmatmul.mubr.msk.bf16.vlgmr.msra.gmra.mrb[44].mxu0 %vm1345_vm2, %v1776_v17  ;;  %v2327_v17 = vld [vmem:[%s3169_s12] ss:$0 sm:$0xff] }
 0x52e   : > { %v1678_v23 = vpop.f32.mrb[28].mxu1  ;;  %2572 = vmatpush3.bf16.msra.mxu0 %v1880_v19  ;;  %2573 = vmatprep.mubr.msk.bf16.mxu0 %vm2686_vm1, %v2685_v9  ;;  %v2649_v22 = vld [vmem:[%s3172_s15 + $0x10] sm:$0xff]  }
 0x52f   : > { %v1777_v24 = vpack.c.bf16 %v1678_v23, %v1678_v23  ;;  %v2545_v25 = vpop.f32.mrb[29].mxu1  ;;  %2583 = vmatprep.subr.bf16.mxu0 %v2685_v9  ;;  %v2650_v23 = vld [vmem:[%s3172_s15 + $0x18] sm:$0xff]  }
 0x530   : > { %v1681_v27 = vpop.f32.mrb[30].mxu1  ;;  %v2652_v25 = vld [vmem:[%s3172_s15 + $0x28] sm:$0xff]  }
 0x531   : > { %v2546_v28 = vpop.f32.mrb[31].mxu1  ;;  %2568 = vmatmul.mubr.msk.bf16.vlgmr.msra.gmra.mrb[36].mxu1 %vm1345_vm2, %v1777_v24  ;;  %v2651_v24 = vld [vmem:[%s3172_s15 + $0x20] sm:$0xff]   ;;  %v2654_v27 = vld [vmem:[%s3172_s15 + $0x38] sm:$0xff]  }
 0x532   : > { %2578 = vmatpush3.bf16.msra.mxu1 %v1926_v26  ;;  %2579 = vmatprep.mubr.msk.bf16.mxu1 %vm2686_vm1, %v2685_v9  ;;  %v2653_v26 = vld [vmem:[%s3172_s15 + $0x30] sm:$0xff]   ;;  %v2328_v28 = vld [vmem:[%s3171_s14] ss:$0 sm:$0xff] }
 0x533   : > { %v1724_v29 = vpop.f32.mrb[40].mxu0  ;;  %2591 = vmatprep.subr.bf16.mxu1 %v2685_v9 }
 0x534   : > { %v1778_v30 = vpack.c.bf16 %v1724_v29, %v1724_v29  ;;  %v2551_v31 = vpop.f32.mrb[41].mxu0 }
 0x535   : > { %v1727_v32 = vpop.f32.mrb[42].mxu0 }
 0x536   : > { %v2552_v33 = vpop.f32.mrb[43].mxu0  ;;  %2574 = vmatmul.mubr.msk.bf16.vlgmr.msra.gmra.mrb[48].mxu0 %vm1345_vm2, %v1778_v30  ;;  %v1770_v34 = vpop.f32.mrb[32].mxu1 }
 0x537   : > { %v1779_v35 = vpack.c.bf16 %v1770_v34, %v1770_v34  ;;  %v2557_v36 = vpop.f32.mrb[33].mxu1  ;;  %2587 = vmatprep.mubr.msk.bf16.mxu0 %vm2686_vm1, %v2685_v9  ;;  %2584 = vmatpush3.bf16.msra.mxu0 %v2645_v8 }
 0x538   : > { %v1773_v37 = vpop.f32.mrb[34].mxu1  ;;  %2585 = vmatprep.subr.bf16.mxu0 %v2685_v9 }
 0x539   : > { %v2558_v39 = vpop.f32.mrb[35].mxu1  ;;  %2580 = vmatmul.mubr.msk.bf16.vlgmr.msra.gmra.mrb[40].mxu1 %vm1345_vm2, %v1779_v35 }
 0x53a   : > { %2607 = vmatprep.mubr.msk.bf16.mxu1 %vm2686_vm1, %v2685_v9  ;;  %2592 = vmatpush3.bf16.msra.mxu1 %v2647_v10 }
 0x53b   : > { %2593 = vmatprep.subr.bf16.mxu1 %v2685_v9 }
 0x53e   : > { %2594 = vmatpush3.bf16.msra.mxu1 %v2648_v21 }
 0x53f   : > { %2595 = vmatprep.subr.bf16.mxu1 %v2685_v9 }
 0x542   : > { %2596 = vmatpush3.bf16.msra.mxu1 %v2649_v22 }
 0x543   : > { %2597 = vmatprep.subr.bf16.mxu1 %v2685_v9 }
 0x546   : > { %2598 = vmatpush3.bf16.msra.mxu1 %v2650_v23 }
 0x547   : > { %2599 = vmatprep.subr.bf16.mxu1 %v2685_v9 }
 0x54a   : > { %2600 = vmatpush3.bf16.msra.mxu1 %v2651_v24 }
 0x54b   : > { %2601 = vmatprep.subr.bf16.mxu1 %v2685_v9 }
 0x54e   : > { %2602 = vmatpush3.bf16.msra.mxu1 %v2652_v25 }
 0x54f   : > { %2603 = vmatprep.subr.bf16.mxu1 %v2685_v9 }
 0x552   : > { %2604 = vmatpush3.bf16.msra.mxu1 %v2653_v26 }
 0x553   : > { %2605 = vmatprep.subr.bf16.mxu1 %v2685_v9 }
 0x556   : > { %2606 = vmatpush3.bf16.msra.mxu1 %v2654_v27 }
 0x600   : > { %v1824_v40 = vpop.f32.mrb[44].mxu0 }
 0x601   : > { %v2563_v41 = vpop.f32.mrb[45].mxu0  ;;  %v1968_v46 = vsel %vm548_vm0, %v1824_v40, 0.0 }
 0x602   : > { %v1827_v43 = vpop.f32.mrb[46].mxu0 }
 0x603   : > { %v2564_v44 = vpop.f32.mrb[47].mxu0 }
 0x604   : > { %v1870_v45 = vpop.f32.mrb[36].mxu1 }
 0x605   : > { %v1969_v47 = vsel %vm548_vm0, %v1870_v45, 0.0  ;;  %v2569_v48 = vpop.f32.mrb[37].mxu1  ;;  %v2332_v45 = vld [vmem:[%s3173_s16] ss:$0 sm:$0xff] }
 0x606   : > { %v1970_v42 = vadd.f32 %v1969_v47, %v1968_v46  ;;  %v1873_v49 = vpop.f32.mrb[38].mxu1 }
 0x607   : > { %v2570_v50 = vpop.f32.mrb[39].mxu1 }
 0x609   : > { %v1916_v51 = vpop.f32.mrb[48].mxu0 }
 0x60a   : > { %v1971_v52 = vsel %vm548_vm0, %v1916_v51, 0.0  ;;  %v2575_v53 = vpop.f32.mrb[49].mxu0 }
 0x60b   : > { %v1972_v54 = vadd.f32 %v1971_v52, %v1970_v42  ;;  %v1919_v55 = vpop.f32.mrb[50].mxu0 }
 0x60c   : > { %v2576_v56 = vpop.f32.mrb[51].mxu0  ;;  %v1962_v57 = vpop.f32.mrb[40].mxu1 }
 0x60d   : > { %v1973_v58 = vsel %vm548_vm0, %v1962_v57, 0.0  ;;  %v2581_v59 = vpop.f32.mrb[41].mxu1 }
 0x60e   : > { %v1974_v61 = vadd.f32 %v1973_v58, %v1972_v54  ;;  %v1965_v62 = vpop.f32.mrb[42].mxu1 }
 0x60f   : > { %v2582_v63 = vpop.f32.mrb[43].mxu1 }
 0x610   : > { %v1975_v2 = vadd.f32 %v1974_v61, %v2793_v0  ;;  %v2646_v0 = vld [vmem:[%s3170_s13 + $0x8] sm:$0xff]  }
 0x611   : > { %2586 = vmatpush3.bf16.msra.mxu0 %v2646_v0 }
 0x612   : > { %v3090_v3 = vadd.f32 %v2325_v1, %v1975_v2 }
 0x614   : > { %v1986_v60 = vsel %vm548_vm0, %v3090_v3, 0.0 }
 0x615   : > { %1987 = vadd.xlane.f32.xlu0 %v1986_v60 }
 0x6a2   : > { %v1988_v4 = vpop.xlane.xlu0 %1987 }
 0x6a3   : > { %v1989_v5 = vmul.f32 0.03125, %v1988_v4 }
 0x6a5   : > { %v1990_v38 = vsub.f32 %v3090_v3, %v1989_v5 }
 0x6a7   : > { %v1991_v6 = vmul.f32 %v1990_v38, %v1990_v38 }
 0x6a9   : > { %v1992_v7 = vsel %vm548_vm0, %v1991_v6, 0.0 }
 0x6aa   : > { %1993 = vadd.xlane.f32.xlu1 %v1992_v7 }
 0x737   : > { %v1994_v11 = vpop.xlane.xlu1 %1993 }
 0x738   : > { %v1995_v12 = vmul.f32 0.03125, %v1994_v11 }
 0x73a   : > { %v1996_v13 = vadd.f32 1e-05, %v1995_v12 }
 0x73c   : > { %2673 = vrsqrt.f32 %v1996_v13 }
 0x746   : > { %v2674_v14 = vpop.eup %2673 }
 0x747   : > { %v1998_v16 = vmul.f32 %v2674_v14, %v1990_v38 }
 0x749   : > { %v2005_v18 = vmul.f32 %v2326_v15, %v1998_v16 }
 0x74b   : > { %v2012_v19 = vadd.f32 %v2327_v17, %v2005_v18 }
 0x74d   : > { %v2013_v20 = vpack.c.bf16 %v2012_v19, %v2012_v19 }
 0x74f   : > { %2588 = vmatmul.mubr.msk.bf16.vlgmr.msra.gmra.mrb[52].mxu0 %vm548_vm0, %v2013_v20 }
 0x822   : > { %v2074_v29 = vpop.f32.mrb[52].mxu0 }
 0x823   : > { %v2075_v30 = vadd.f32 %v2328_v28, %v2074_v29  ;;  %v2589_v31 = vpop.f32.mrb[53].mxu0 }
 0x824   : > { %v2077_v32 = vpop.f32.mrb[54].mxu0 }
 0x825   : > { %v2081_v33 = vmul.f32 0.044715, %v2075_v30  ;;  %v2590_v34 = vpop.f32.mrb[55].mxu0  ;;  %v2080_v41 = vmul.f32 0.5, %v2075_v30 }
 0x827   : > { %v2082_v35 = vmul.f32 %v2081_v33, %v2075_v30 }
 0x829   : > { %v2083_v36 = vmul.f32 %v2082_v35, %v2075_v30 }
 0x82b   : > { %v2084_v37 = vadd.f32 %v2083_v36, %v2075_v30 }
 0x82d   : > { %v2085_v39 = vmul.f32 0.7978846, %v2084_v37 }
 0x82f   : > { %2675 = vtanh.f32 %v2085_v39 }
 0x839   : > { %v2676_v40 = vpop.eup %2675 }
 0x83a   : > { %v2087_v9 = vadd.f32 1.0, %v2676_v40 }
 0x83c   : > { %v2088_v43 = vmul.f32 %v2087_v9, %v2080_v41 }
 0x83e   : > { %v2089_v44 = vpack.c.bf16 %v2088_v43, %v2088_v43 }
 0x840   : > { %2608 = vmatmul.mubr.bf16.vlgmr.msra.gmra.mrb[44].mxu1 %v2089_v44 }
 0x913   : > { %v2195_v46 = vpop.f32.mrb[44].mxu1 }
 0x914   : > { %v2196_v47 = vadd.f32 %v2332_v45, %v2195_v46  ;;  %v2609_v48 = vpop.f32.mrb[45].mxu1 }
 0x915   : > { %v2198_v42 = vpop.f32.mrb[46].mxu1 }
 0x916   : > { %v2201_v49 = vadd.f32 %v2196_v47, %v3090_v3  ;;  %v2610_v50 = vpop.f32.mrb[47].mxu1 }
 0x918   : > { %2202 = vst.msk [vmem:[%s543_s28] sm:$0xff] %vm548_vm0, %v2201_v49 }
 0x919 PF: > { %s27_s24 = sadd.s32 1, %s2683_s24  }
 0x91a   : > { %p24_p4 = scmp.ge.s32.totalorder %s27_s24, 4  }
 0x91c   :  { %26 = sbr.rel (!%p24_p4) target bundleno = 3 (0x3), region = 118 }

// kernel: tabular_baseline_forward.3
= control target key start
LH: loop header
LB: loop body
LE: loop exit
PB: predicated region body
PF: predicated region fallthrough
CT: control target
= control target key end

     0   :  { %s3447_s0 = inlined_call_operand.vmem [shape: f32[2,8,32], index: 0, kind: input, shape index: {}]   ;;  %s3448_s1 = inlined_call_operand.vmem [shape: f32[1,32], index: 1, kind: input, shape index: {}]   ;;  %s3449_s2 = inlined_call_operand.vmem [shape: f32[1,32], index: 2, kind: input, shape index: {}]   ;;  %s3450_s3 = inlined_call_operand.vmem [shape: bf16[4,32,8], index: 3, kind: input, shape index: {}]   ;;  %s3451_s4 = inlined_call_operand.vmem [shape: bf16[4,32,8], index: 4, kind: input, shape index: {}]   ;;  %s3452_s5 = inlined_call_operand.vmem [shape: bf16[4,32,8], index: 5, kind: input, shape index: {}]   ;;  %s3453_s6 = inlined_call_operand.vmem [shape: f32[4,1,8], index: 6, kind: input, shape index: {}]   ;;  %s3454_s7 = inlined_call_operand.vmem [shape: f32[4,1,8], index: 7, kind: input, shape index: {}]   ;;  %s3455_s8 = inlined_call_operand.vmem [shape: f32[4,1,8], index: 8, kind: input, shape index: {}]   ;;  %s3456_s9 = inlined_call_operand.vmem [shape: bf16[4,8,32], index: 9, kind: input, shape index: {}]   ;;  %s3457_s10 = inlined_call_operand.vmem [shape: f32[1,32], index: 10, kind: input, shape index: {}]   ;;  %s3458_s11 = inlined_call_operand.vmem [shape: f32[1,32], index: 11, kind: input, shape index: {}]   ;;  %s3459_s12 = inlined_call_operand.vmem [shape: f32[1,32], index: 12, kind: input, shape index: {}]   ;;  %s3460_s13 = inlined_call_operand.vmem [shape: bf16[32,128], index: 13, kind: input, shape index: {}]   ;;  %s3461_s14 = inlined_call_operand.vmem [shape: f32[1,128], index: 14, kind: input, shape index: {}]   ;;  %s3462_s15 = inlined_call_operand.vmem [shape: bf16[128,32], index: 15, kind: input, shape index: {}]   ;;  %s3463_s16 = inlined_call_operand.vmem [shape: f32[1,32], index: 16, kind: input, shape index: {}]   ;;  %s3464_s17 = inlined_call_operand.vmem [shape: f32[1,32], index: 17, kind: input, shape index: {}]   ;;  %s3465_s18 = inlined_call_operand.vmem [shape: f32[1,32], index: 18, kind: input, shape index: {}]   ;;  %s3466_s19 = inlined_call_operand.hbm [shape: f32[2,8,32], index: 19, kind: output, shape index: {}]  }
   0x1   :  { %3474 = sst [smem:[#allocation10_spill]] %s3447_s0 }
   0x2   :  { %3475 = sst [smem:[#allocation11_spill]] %s3448_s1 }
   0x3   :  { %3476 = sst [smem:[#allocation12_spill]] %s3449_s2 }
   0x4   :  { %3477 = sst [smem:[#allocation13_spill]] %s3450_s3 }
   0x5   :  { %3478 = sst [smem:[#allocation14_spill]] %s3451_s4 }
   0x6   :  { %24 = vsyncpa [#allocation3], 0 }
   0x7   :  { %26 = vsyncpa [#allocation3 + $0x1], 0  ;;  %s2983_s0 = smov 0   ;;  %s2985_s30 = smov 0  }
   0x8   :  { %s2987_s20 = smov 0   ;;  %s2989_s21 = smov 0  }
   0x9 LB: > { %3479 = sst [smem:[#allocation5_spill]] %s2866_s0  ;;  %s3004_s1 = sadd.s32 4294967295, %s2878_s21   ;;  %s2878_s21 = sphi %s2989_s21, %s3494_s21   ;;  %s2874_s20 = sphi %s2987_s20, %s3496_s20   ;;  %s2870_s30 = sphi %s2985_s30, %s3498_s30   ;;  %s2866_s0 = sphi %s2983_s0, %s3497_s0  }
   0xa   : > { %3480 = sst [smem:[#allocation6_spill]] %s2874_s20  ;;  %s2359_s22 = sadd.s32 4294967294, %s2878_s21  }
   0xb   : > { %s3008_s2 = sadd.s32 1, %s2878_s21   ;;  %s443_s23 = sadd.s32 1, %s2874_s20 }
   0xc   : > { %3481 = sst [smem:[#allocation7_spill]] %s3008_s2  ;;  %s440_s24 = ssub.s32 %s2878_s21, %s3008_s2 }
   0xd   : > { %p453_p0 = scmp.ne.s32.totalorder %s2874_s20, %s2870_s30  ;;  %p441_p1 = scmp.eq.s32.totalorder %s440_s24, 0 }
   0xe   : > { %p454_p2 = scmp.eq.s32.totalorder %s3004_s1, 1  ;;  %p459_p3 = scmp.ne.s32.totalorder %s2870_s30, %s2866_s0 }
   0xf   : > { %p460_p4 = scmp.eq.s32.totalorder %s2359_s22, 1  ;;  %p2362_p7 = scmp.ge.s32.totalorder %s2878_s21, 1 }
  0x10   : > { %s3019_s25 = scalar_select %p441_p1, %s2874_s20, %s443_s23  }
  0x11   : > { %p3021_p5 = por %p454_p2, %p453_p0  ;;  %p3025_p6 = por %p460_p4, %p459_p3 }
  0x12   : > { %3482 = sst [smem:[#allocation8_spill]] %s3019_s25  ;;  %p539_p8 = scmp.lt.s32.totalorder %s2878_s21, 3 }
  0x13   : > { %s3484_s26 = scalar_select %p3025_p6, 1, 0 }
  0x14   : > { %p540_p9 = pnand %p2362_p7, %p539_p8 }
  0x15   : > { %3485 = sst [smem:[#allocation9_spill]] %s3484_s26  ;;  %p594_p10 = scmp.lt.s32.totalorder (!%p540_p9), %s3004_s1, 1  ;;  %vm602_vm0 = vcmask (!%p540_p9), 261120   ;;  %v2880_v9 = vmov (!%p540_p9), 0.0   ;;  %vm2881_vm1 = vmmov (!%p540_p9), 0   ;;  %v2771_v31 = vld [vmem:[%s3452_s5 + $0x10] sm:$0xff] (!%p540_p9)  }
  0x16   : > { %543 = sbr.rel (%p540_p9) target bundleno = 2670 (0xa6e), region = 96  ;;  %s3486_s23 = sld [smem:[#allocation10_spill]] (!%p540_p9)  ;;  %2521 = vmatprep.subr.bf16.mxu0 (!%p540_p9), %v2880_v9  ;;  %2545 = vmatprep.subr.bf16.mxu1 (!%p540_p9), %v2880_v9  ;;  %v2773_v33 = vld [vmem:[%s3452_s5 + $0x18] sm:$0xff] (!%p540_p9)   ;;  %v2775_v35 = vld [vmem:[%s3452_s5 + $0x30] sm:$0xff] (!%p540_p9)   ;;  %v2778_v38 = vld [vmem:[%s3452_s5] sm:$0xff] (!%p540_p9)   ;;  %vm1399_vm2 = vcmask (!%p540_p9), 64512  }
  0x17   : > { %s3487_s20 = sld [smem:[#allocation13_spill]] (!%p540_p9)  ;;  %2525 = vmatprep.mubr.msk.bf16.mxu0 (!%p540_p9), %vm2881_vm1, %v2880_v9  ;;  %2549 = vmatprep.mubr.msk.bf16.mxu1 (!%p540_p9), %vm2881_vm1, %v2880_v9  ;;  %s3489_s29 = sld [smem:[#allocation11_spill]] (!%p540_p9)  ;;  %v2777_v37 = vld [vmem:[%s3452_s5 + $0x38] sm:$0xff] (!%p540_p9)   ;;  %v2779_v39 = vld [vmem:[%s3452_s5 + $0x8] sm:$0xff] (!%p540_p9)   ;;  %v2780_v40 = vld [vmem:[%s3452_s5 + $0x20] sm:$0xff] (!%p540_p9)   ;;  %vm1648_vm3 = vcmask (!%p540_p9), 1043456  }
  0x18   : > { %s3491_s4 = sld [smem:[#allocation14_spill]] (!%p540_p9)  ;;  %v2781_v41 = vld [vmem:[%s3452_s5 + $0x28] sm:$0xff] (!%p540_p9)   ;;  %v2384_v50 = vld [vmem:[%s3454_s7 + $0x1] ss:$0 sm:$0xff] (!%p540_p9)  ;;  %v2386_v63 = vld [vmem:[%s3454_s7 + $0x3] ss:$0 sm:$0xff] (!%p540_p9) }
  0x19   : > { %v2368_v61 = vld [vmem:[%s3453_s6 + $0x1] ss:$0 sm:$0xff] (!%p540_p9)  ;;  %s2446_s0 = sshll.u32 (!%p540_p9), %s3004_s1, 7 }
  0x1d   : > { %s595_s27 = scalar_select %p594_p10, %s3004_s1, 1  ;;  %v2758_v7 = vld [vmem:[%s3487_s20] sm:$0xff]  }
  0x1e   : > { %s3488_s2 = smov %s3487_s20  ;;  %2522 = vmatpush3.bf16.msra.mxu0 %v2758_v7  ;;  %v2365_v16 = vld [vmem:[%s3489_s29] ss:$0 sm:$0xff]  ;;  %v2763_v22 = vld [vmem:[%s3491_s4 + $0x10] sm:$0xff]   ;;  %v2765_v25 = vld [vmem:[%s3491_s4 + $0x18] sm:$0xff]   ;;  %s591_s20 = sand.u32 1, %s2870_s30  }
  0x1f   : > { %s2364_s28 = sshll.u32 %s595_s27, 3  ;;  %v2759_v8 = vld [vmem:[%s3488_s2 + $0x30] sm:$0xff]   ;;  %2523 = vmatprep.subr.bf16.mxu0 %v2880_v9  ;;  %v2760_v10 = vld [vmem:[%s3488_s2 + $0x8] sm:$0xff]   ;;  %v2761_v11 = vld [vmem:[%s3488_s2 + $0x38] sm:$0xff]   ;;  %s2363_s25 = sshll.u32 %s591_s20, 3 }
  0x20   : > { %s597_s24 = scalar_lea.vmem %s3486_s23, %s2364_s28  ;;  %2546 = vmatpush3.bf16.msra.mxu1 %v2759_v8  ;;  %s3490_s23 = sld [smem:[#allocation12_spill]]  ;;  %v2762_v21 = vld [vmem:[%s3488_s2 + $0x10] sm:$0xff]   ;;  %v2764_v24 = vld [vmem:[%s3488_s2 + $0x18] sm:$0xff]   ;;  %v2766_v26 = vld [vmem:[%s3488_s2 + $0x20] sm:$0xff]  }
  0x21   : > { %v3036_v0 = vld [vmem:[%s597_s24] sm:$0xff]  ;;  %2547 = vmatprep.subr.bf16.mxu1 %v2880_v9  ;;  %v2767_v27 = vld [vmem:[%s3491_s4 + $0x30] sm:$0xff]   ;;  %v2768_v28 = vld [vmem:[%s3488_s2 + $0x28] sm:$0xff]   ;;  %s593_s26 = scalar_lea.vmem [#allocation2], %s2363_s25  ;;  %s2287_s24 = scalar_lea.sflag [#allocation3], %s591_s20 }
  0x22   : > { %v603_v1 = vsel %vm602_vm0, %v3036_v0, 0.0  ;;  %2524 = vmatpush3.bf16.msra.mxu0 %v2760_v10  ;;  %v2769_v29 = vld [vmem:[%s3491_s4 + $0x38] sm:$0xff]   ;;  %v2770_v30 = vld [vmem:[%s3491_s4] sm:$0xff]   ;;  %v2772_v32 = vld [vmem:[%s3491_s4 + $0x8] sm:$0xff]   ;;  %s2300_s22 = sshll.u32 %s593_s26, 4  ;;  %s2882_s1 = smov [#allocation2]   ;;  %s3406_s22 = int_to_ptr.vmem [resolvable:$true] %s2300_s22 }
  0x23   : > { %604 = vadd.xlane.f32.xlu0 %v603_v1  ;;  %2529 = vmatprep.subr.bf16.mxu0 %v2880_v9  ;;  %v2774_v34 = vld [vmem:[%s3491_s4 + $0x20] sm:$0xff]   ;;  %v2776_v36 = vld [vmem:[%s3491_s4 + $0x28] sm:$0xff]   ;;  %s3404_s4 = scalar_lea.hbm %s3466_s19, %s2446_s0  ;;  %s2816_s27 = scalar_lea.vmem %s3406_s22, 128 }
  0x24   : > { %2548 = vmatpush3.bf16.msra.mxu1 %v2761_v11  ;;  %p2817_p11 = scmp.ne.s32.totalorder %s3406_s22, %s2816_s27  ;;  %s2820_s25 = sshll.u32 %s2882_s1, 4  ;;  %s2821_s25 = int_to_ptr.vmem [resolvable:$false] %s2820_s25 }
  0x25   : > { %2561 = vmatprep.subr.bf16.mxu1 %v2880_v9  ;;  %s2822_s29 = scalar_lea.vmem %s2821_s25, 256  ;;  %p2823_p0 = scmp.lt.s32.totalorder %s3406_s22, %s2821_s25 }
  0x26   : > { %v2366_v18 = vld [vmem:[%s3490_s23] ss:$0 sm:$0xff]  ;;  %p2818_p12 = pnand %p2817_p11, %p3021_p5  ;;  %p2824_p1 = scmp.lt.s32.totalorder %s2822_s29, %s2816_s27 }
  0x28   : > { %p2819_p13 = pneg %p2818_p12  ;;  %p2825_p2 = por %p2824_p1, %p2823_p0 }
  0x2a   : > { %p2826_p3 = pnand %p2825_p2, %p2819_p13 }
  0xb0   : > { %v605_v2 = vpop.xlane.xlu0 %604 }
  0xb1   : > { %v607_v3 = vmul.f32 0.03125, %v605_v2 }
  0xb3   : > { %v608_v4 = vsub.f32 %v3036_v0, %v607_v3 }
  0xb5   : > { %v609_v5 = vmul.f32 %v608_v4, %v608_v4 }
  0xb7   : > { %v610_v6 = vsel %vm602_vm0, %v609_v5, 0.0 }
  0xb8   : > { %611 = vadd.xlane.f32.xlu0 %v610_v6 }
 0x145   : > { %v612_v12 = vpop.xlane.xlu0 %611 }
 0x146   : > { %v613_v13 = vmul.f32 0.03125, %v612_v12 }
 0x148   : > { %v614_v14 = vadd.f32 1e-05, %v613_v13 }
 0x14a   : > { %2792 = vrsqrt.f32 %v614_v14  ;;  %v2370_v14 = vld [vmem:[%s3453_s6 + $0x3] ss:$0 sm:$0xff] }
 0x154   : > { %v2793_v15 = vpop.eup %2792 }
 0x155   : > { %v616_v17 = vmul.f32 %v2793_v15, %v608_v4 }
 0x157   : > { %v623_v19 = vmul.f32 %v2365_v16, %v616_v17  ;;  %v2383_v16 = vld [vmem:[%s3454_s7] ss:$0 sm:$0xff]  ;;  %v2400_v17 = vld [vmem:[%s3455_s8 + $0x1] ss:$0 sm:$0xff] }
 0x159   : > { %v630_v20 = vadd.f32 %v2366_v18, %v623_v19 }
 0x15b   : > { %v3076_v23 = vpack.c.bf16 %v630_v20, %v630_v20 }
 0x15d   : > { %2526 = vmatmul.mubr.msk.bf16.vlgmr.msra.gmra.mrb[0].mxu0 %vm602_vm0, %v3076_v23  ;;  %2550 = vmatmul.mubr.msk.bf16.vlgmr.msra.gmra.mrb[0].mxu1 %vm602_vm0, %v3076_v23 }
 0x15e   : > { %2530 = vmatpush3.bf16.msra.mxu0 %v2762_v21  ;;  %2562 = vmatpush3.bf16.msra.mxu1 %v2763_v22 }
 0x15f   : > { %2531 = vmatprep.subr.bf16.mxu0 %v2880_v9  ;;  %2563 = vmatprep.subr.bf16.mxu1 %v2880_v9 }
 0x160   : > { %2533 = vmatprep.mubr.msk.bf16.mxu0 %vm2881_vm1, %v2880_v9  ;;  %2565 = vmatprep.mubr.msk.bf16.mxu1 %vm2881_vm1, %v2880_v9 }
 0x162   : > { %2532 = vmatpush3.bf16.msra.mxu0 %v2764_v24  ;;  %2564 = vmatpush3.bf16.msra.mxu1 %v2765_v25 }
 0x163   : > { %2537 = vmatprep.subr.bf16.mxu0 %v2880_v9  ;;  %2577 = vmatprep.subr.bf16.mxu1 %v2880_v9 }
 0x165   : > { %2534 = vmatmul.mubr.msk.bf16.vlgmr.msra.gmra.mrb[4].mxu0 %vm602_vm0, %v3076_v23  ;;  %2566 = vmatmul.mubr.msk.bf16.vlgmr.msra.gmra.mrb[4].mxu1 %vm602_vm0, %v3076_v23 }
 0x166   : > { %2538 = vmatpush3.bf16.msra.mxu0 %v2766_v26  ;;  %2578 = vmatpush3.bf16.msra.mxu1 %v2767_v27 }
 0x167   : > { %2539 = vmatprep.subr.bf16.mxu0 %v2880_v9  ;;  %2579 = vmatprep.subr.bf16.mxu1 %v2880_v9 }
 0x168   : > { %2541 = vmatprep.mubr.msk.bf16.mxu0 %vm2881_vm1, %v2880_v9  ;;  %2581 = vmatprep.mubr.msk.bf16.mxu1 %vm2881_vm1, %v2880_v9 }
 0x16a   : > { %2540 = vmatpush3.bf16.msra.mxu0 %v2768_v28  ;;  %2580 = vmatpush3.bf16.msra.mxu1 %v2769_v29 }
 0x16b   : > { %2553 = vmatprep.subr.bf16.mxu0 %v2880_v9  ;;  %2593 = vmatprep.subr.bf16.mxu1 %v2880_v9 }
 0x16d   : > { %2542 = vmatmul.mubr.msk.bf16.vlgmr.msra.gmra.mrb[8].mxu0 %vm602_vm0, %v3076_v23  ;;  %2582 = vmatmul.mubr.msk.bf16.vlgmr.msra.gmra.mrb[8].mxu1 %vm602_vm0, %v3076_v23 }
 0x16e   : > { %2554 = vmatpush3.bf16.msra.mxu0 %v2770_v30  ;;  %2594 = vmatpush3.bf16.msra.mxu1 %v2771_v31 }
 0x16f   : > { %2555 = vmatprep.subr.bf16.mxu0 %v2880_v9  ;;  %2595 = vmatprep.subr.bf16.mxu1 %v2880_v9 }
 0x170   : > { %2557 = vmatprep.mubr.msk.bf16.mxu0 %vm2881_vm1, %v2880_v9  ;;  %2597 = vmatprep.mubr.msk.bf16.mxu1 %vm2881_vm1, %v2880_v9 }
 0x172   : > { %2556 = vmatpush3.bf16.msra.mxu0 %v2772_v32  ;;  %2596 = vmatpush3.bf16.msra.mxu1 %v2773_v33  ;;  %v2367_v32 = vld [vmem:[%s3453_s6] ss:$0 sm:$0xff] }
 0x173   : > { %2569 = vmatprep.subr.bf16.mxu0 %v2880_v9  ;;  %2609 = vmatprep.subr.bf16.mxu1 %v2880_v9 }
 0x175   : > { %2558 = vmatmul.mubr.msk.bf16.vlgmr.msra.gmra.mrb[12].mxu0 %vm602_vm0, %v3076_v23  ;;  %2598 = vmatmul.mubr.msk.bf16.vlgmr.msra.gmra.mrb[12].mxu1 %vm602_vm0, %v3076_v23 }
 0x176   : > { %2570 = vmatpush3.bf16.msra.mxu0 %v2774_v34  ;;  %2610 = vmatpush3.bf16.msra.mxu1 %v2775_v35  ;;  %v2385_v35 = vld [vmem:[%s3454_s7 + $0x2] ss:$0 sm:$0xff] }
 0x177   : > { %2571 = vmatprep.subr.bf16.mxu0 %v2880_v9  ;;  %2611 = vmatprep.subr.bf16.mxu1 %v2880_v9 }
 0x178   : > { %2573 = vmatprep.mubr.msk.bf16.mxu0 %vm2881_vm1, %v2880_v9  ;;  %2613 = vmatprep.mubr.msk.bf16.mxu1 %vm2881_vm1, %v2880_v9 }
 0x17a   : > { %2572 = vmatpush3.bf16.msra.mxu0 %v2776_v36  ;;  %2612 = vmatpush3.bf16.msra.mxu1 %v2777_v37 }
 0x17b   : > { %2585 = vmatprep.subr.bf16.mxu0 %v2880_v9  ;;  %2623 = vmatprep.subr.bf16.mxu1 %v2880_v9 }
 0x17d   : > { %2574 = vmatmul.mubr.msk.bf16.vlgmr.msra.gmra.mrb[16].mxu0 %vm602_vm0, %v3076_v23  ;;  %2614 = vmatmul.mubr.msk.bf16.vlgmr.msra.gmra.mrb[16].mxu1 %vm602_vm0, %v3076_v23 }
 0x17e   : > { %2586 = vmatpush3.bf16.msra.mxu0 %v2778_v38  ;;  %2589 = vmatprep.mubr.msk.bf16.mxu0 %vm2881_vm1, %v2880_v9 }
 0x17f   : > { %2587 = vmatprep.subr.bf16.mxu0 %v2880_v9  ;;  %2625 = vmatprep.mubr.msk.bf16.mxu1 %vm2881_vm1, %v2880_v9 }
 0x182   : > { %2588 = vmatpush3.bf16.msra.mxu0 %v2779_v39 }
 0x183   : > { %2601 = vmatprep.subr.bf16.mxu0 %v2880_v9 }
 0x185   : > { %2590 = vmatmul.mubr.msk.bf16.vlgmr.msra.gmra.mrb[20].mxu0 %vm602_vm0, %v3076_v23 }
 0x186   : > { %2602 = vmatpush3.bf16.msra.mxu0 %v2780_v40  ;;  %2605 = vmatprep.mubr.msk.bf16.mxu0 %vm2881_vm1, %v2880_v9 }
 0x187   : > { %2603 = vmatprep.subr.bf16.mxu0 %v2880_v9 }
 0x18a   : > { %2604 = vmatpush3.bf16.msra.mxu0 %v2781_v41 }
 0x18b   : > { %2617 = vmatprep.subr.bf16.mxu0 %v2880_v9 }
 0x18d   : > { %2606 = vmatmul.mubr.msk.bf16.vlgmr.msra.gmra.mrb[24].mxu0 %vm602_vm0, %v3076_v23 }
 0x18e   : > { %2619 = vmatprep.mubr.msk.bf16.mxu0 %vm2881_vm1, %v2880_v9 }
 0x230   : > { %v3200_v42 = vpop.f32.mrb[0].mxu0  ;;  %v881_v43 = vpop.f32.mrb[0].mxu1 }
 0x231   : > { %v2527_v44 = vpop.f32.mrb[1].mxu0  ;;  %v2551_v45 = vpop.f32.mrb[1].mxu1  ;;  %v882_v18 = vadd.f32 %v2370_v14, %v881_v43  ;;  %v726_v36 = vadd.f32 %v2367_v32, %v3200_v42  ;;  %v2369_v42 = vld [vmem:[%s3453_s6 + $0x2] ss:$0 sm:$0xff] }
 0x232   : > { %v728_v46 = vpop.f32.mrb[2].mxu0  ;;  %v884_v47 = vpop.f32.mrb[2].mxu1 }
 0x233   : > { %v2528_v48 = vpop.f32.mrb[3].mxu0  ;;  %v2552_v49 = vpop.f32.mrb[3].mxu1  ;;  %v1394_v27 = vpack.c.bf16 %v882_v18, %v882_v18  ;;  %v1391_v45 = vpack.c.bf16 %v726_v36, %v726_v36 }
 0x238   : > { %v777_v51 = vpop.f32.mrb[4].mxu0  ;;  %v1029_v52 = vpop.f32.mrb[4].mxu1 }
 0x239   : > { %v1030_v53 = vadd.f32 %v2384_v50, %v1029_v52  ;;  %v2535_v54 = vpop.f32.mrb[5].mxu0  ;;  %v2567_v55 = vpop.f32.mrb[5].mxu1  ;;  %v778_v1 = vadd.f32 %v2368_v61, %v777_v51  ;;  %v2399_v50 = vld [vmem:[%s3455_s8] ss:$0 sm:$0xff] }
 0x23a   : > { %v780_v56 = vpop.f32.mrb[6].mxu0  ;;  %v1032_v57 = vpop.f32.mrb[6].mxu1 }
 0x23b   : > { %v1396_v58 = vpack.c.bf16 %v1030_v53, %v1030_v53  ;;  %v2536_v59 = vpop.f32.mrb[7].mxu0  ;;  %v2568_v60 = vpop.f32.mrb[7].mxu1  ;;  %v1392_v10 = vpack.c.bf16 %v778_v1, %v778_v1 }
 0x23d   : > { %v1450_v62 = vsel %vm1399_vm2, %v1396_v58, 0 }
 0x23e   : > { %2624 = vmatpush3.bf16.xpose.msra.mxu1 %v1450_v62 }
 0x23f   : > { %2635 = vmatprep.subr.bf16.mxu1 %v2880_v9 }
 0x240   : > { %v829_v2 = vpop.f32.mrb[8].mxu0  ;;  %v1133_v3 = vpop.f32.mrb[8].mxu1 }
 0x241   : > { %v1134_v4 = vadd.f32 %v2386_v63, %v1133_v3  ;;  %v2543_v5 = vpop.f32.mrb[9].mxu0  ;;  %v2583_v6 = vpop.f32.mrb[9].mxu1  ;;  %v830_v51 = vadd.f32 %v2369_v42, %v829_v2 }
 0x242   : > { %v832_v7 = vpop.f32.mrb[10].mxu0  ;;  %v1136_v8 = vpop.f32.mrb[10].mxu1  ;;  %v1584_v5 = vlaneseq }
 0x243   : > { %v1398_v11 = vpack.c.bf16 %v1134_v4, %v1134_v4  ;;  %v2544_v12 = vpop.f32.mrb[11].mxu0  ;;  %v2584_v13 = vpop.f32.mrb[11].mxu1  ;;  %v1393_v56 = vpack.c.bf16 %v830_v51, %v830_v51 }
 0x244   : > { %v1587_v12 = vand.u32 127, %v1584_v5 }
 0x245   : > { %v1542_v15 = vsel %vm1399_vm2, %v1398_v11, 0  ;;  %2626 = vmatmul.mubr.msk.bf16.vlgmr.msra.gmra.mrb[20].mxu1 %vm1399_vm2, %v1392_v10  ;;  %v1585_v11 = vshrl.u32 %v1584_v5, 7 }
 0x246   : > { %2636 = vmatpush3.bf16.xpose.msra.mxu1 %v1542_v15  ;;  %2637 = vmatprep.mubr.msk.bf16.mxu1 %vm2881_vm1, %v2880_v9 }
 0x247   : > { %2647 = vmatprep.subr.bf16.mxu1 %v2880_v9  ;;  %vm1588_vm4 = vcmp.le.s32.totalorder %v1587_v12, %v1585_v11 }
 0x248   : > { %v977_v19 = vpop.f32.mrb[12].mxu0  ;;  %v1281_v20 = vpop.f32.mrb[12].mxu1 }
 0x249   : > { %v978_v21 = vadd.f32 %v2383_v16, %v977_v19  ;;  %v1282_v22 = vadd.f32 %v2400_v17, %v1281_v20  ;;  %v2559_v23 = vpop.f32.mrb[13].mxu0  ;;  %v2599_v24 = vpop.f32.mrb[13].mxu1 }
 0x24a   : > { %v980_v25 = vpop.f32.mrb[14].mxu0  ;;  %v1284_v26 = vpop.f32.mrb[14].mxu1 }
 0x24b   : > { %v1395_v28 = vpack.c.bf16 %v978_v21, %v978_v21  ;;  %v1642_v29 = vpack.c.bf16 %v1282_v22, %v1282_v22  ;;  %v2560_v30 = vpop.f32.mrb[15].mxu0  ;;  %v2600_v31 = vpop.f32.mrb[15].mxu1 }
 0x24d   : > { %v1404_v33 = vsel %vm1399_vm2, %v1395_v28, 0  ;;  %v1696_v34 = vsel %vm1648_vm3, %v1642_v29, 0  ;;  %2638 = vmatmul.mubr.msk.bf16.vlgmr.msra.gmra.mrb[24].mxu1 %vm1399_vm2, %v1394_v27 }
 0x24e   : > { %2618 = vmatpush3.bf16.xpose.msra.mxu0 %v1404_v33  ;;  %2648 = vmatpush3.bf16.msra.mxu1 %v1696_v34 }
 0x24f   : > { %2629 = vmatprep.subr.bf16.mxu0 %v2880_v9  ;;  %2649 = vmatprep.mubr.msk.bf16.mxu1 %vm2881_vm1, %v2880_v9 }
 0x250   : > { %v1081_v37 = vpop.f32.mrb[16].mxu0  ;;  %v3240_v38 = vpop.f32.mrb[16].mxu1  ;;  %2659 = vmatprep.subr.bf16.mxu1 %v2880_v9 }
 0x251   : > { %v1082_v39 = vadd.f32 %v2385_v35, %v1081_v37  ;;  %v2575_v40 = vpop.f32.mrb[17].mxu0  ;;  %v2615_v41 = vpop.f32.mrb[17].mxu1 }
 0x252   : > { %v1084_v43 = vpop.f32.mrb[18].mxu0  ;;  %v1388_v44 = vpop.f32.mrb[18].mxu1 }
 0x253   : > { %v1397_v46 = vpack.c.bf16 %v1082_v39, %v1082_v39  ;;  %v2576_v47 = vpop.f32.mrb[19].mxu0  ;;  %v2616_v48 = vpop.f32.mrb[19].mxu1 }
 0x255   : > { %v1496_v49 = vsel %vm1399_vm2, %v1397_v46, 0  ;;  %2620 = vmatmul.mubr.msk.bf16.vlgmr.msra.gmra.mrb[28].mxu0 %vm1399_vm2, %v1391_v45 }
 0x256   : > { %2630 = vmatpush3.bf16.xpose.msra.mxu0 %v1496_v49  ;;  %2631 = vmatprep.mubr.msk.bf16.mxu0 %vm2881_vm1, %v2880_v9 }
 0x257   : > { %2641 = vmatprep.subr.bf16.mxu0 %v2880_v9 }
 0x258   : > { %v1229_v52 = vpop.f32.mrb[20].mxu0 }
 0x259   : > { %v1230_v53 = vadd.f32 %v2399_v50, %v1229_v52  ;;  %v2591_v54 = vpop.f32.mrb[21].mxu0  ;;  %v2401_v52 = vld [vmem:[%s3455_s8 + $0x2] ss:$0 sm:$0xff] }
 0x25a   : > { %v1232_v55 = vpop.f32.mrb[22].mxu0 }
 0x25b   : > { %v1641_v57 = vpack.c.bf16 %v1230_v53, %v1230_v53  ;;  %v2592_v58 = vpop.f32.mrb[23].mxu0  ;;  %v2402_v55 = vld [vmem:[%s3455_s8 + $0x3] ss:$0 sm:$0xff] }
 0x25c   : > { %v1386_v58 = vadd.f32 %v2402_v55, %v3240_v38 }
 0x25d   : > { %v1650_v59 = vsel %vm1648_vm3, %v1641_v57, 0  ;;  %2632 = vmatmul.mubr.msk.bf16.vlgmr.msra.gmra.mrb[32].mxu0 %vm1399_vm2, %v1393_v56 }
 0x25e   : > { %2642 = vmatpush3.bf16.msra.mxu0 %v1650_v59  ;;  %2643 = vmatprep.mubr.msk.bf16.mxu0 %vm2881_vm1, %v2880_v9 }
 0x25f   : > { %2653 = vmatprep.subr.bf16.mxu0 %v2880_v9 }
 0x260   : > { %v3259_v60 = vpop.f32.mrb[24].mxu0 }
 0x261   : > { %v2607_v61 = vpop.f32.mrb[25].mxu0  ;;  %v1334_v53 = vadd.f32 %v2401_v52, %v3259_v60 }
 0x262   : > { %v1336_v62 = vpop.f32.mrb[26].mxu0 }
 0x263   : > { %v2608_v63 = vpop.f32.mrb[27].mxu0  ;;  %v1643_v59 = vpack.c.bf16 %v1334_v53, %v1334_v53 }
 0x318   : > { %v1486_v1 = vpop.f32.mrb[20].mxu1 }
 0x319   : > { %v2627_v2 = vpop.f32.mrb[21].mxu1  ;;  %v1590_v18 = vsel %vm1588_vm4, %v1486_v1, -1e+30  ;;  %v1644_v1 = vpack.c.bf16 %v1386_v58, %v1386_v58 }
 0x31a   : > { %v1489_v3 = vpop.f32.mrb[22].mxu1  ;;  %v1596_v20 = vsel %vm1399_vm2, %v1590_v18, -inf  ;;  %v1742_v2 = vsel %vm1648_vm3, %v1643_v59, 0 }
 0x31b   : > { %v2628_v4 = vpop.f32.mrb[23].mxu1  ;;  %v1788_v38 = vsel %vm1648_vm3, %v1644_v1, 0  ;;  %v2427_v1 = vld [vmem:[%s3457_s10] ss:$0 sm:$0xff] }
 0x320   : > { %v1578_v6 = vpop.f32.mrb[24].mxu1 }
 0x321   : > { %v2639_v7 = vpop.f32.mrb[25].mxu1  ;;  %v1592_v21 = vsel %vm1588_vm4, %v1578_v6, -1e+30  ;;  %v1834_v6 = vld [vmem:[%s3456_s9] sm:$0xf] }
 0x322   : > { %v1581_v8 = vpop.f32.mrb[26].mxu1  ;;  %v1602_v26 = vsel %vm1399_vm2, %v1592_v21, -inf  ;;  %v1842_v11 = vsel %vm1648_vm3, %v1834_v6, 0 }
 0x323   : > { %v2640_v10 = vpop.f32.mrb[27].mxu1 }
 0x328   : > { %v1440_v13 = vpop.f32.mrb[28].mxu0 }
 0x329   : > { %v1589_v14 = vsel %vm1588_vm4, %v1440_v13, -1e+30  ;;  %v2621_v15 = vpop.f32.mrb[29].mxu0  ;;  %v1835_v13 = vld [vmem:[%s3456_s9 + $0x4] sm:$0xf] }
 0x32a   : > { %v1443_v16 = vpop.f32.mrb[30].mxu0  ;;  %v1593_v17 = vsel %vm1399_vm2, %v1589_v14, -inf  ;;  %v1836_v15 = vld [vmem:[%s3456_s9 + $0x8] sm:$0xf] }
 0x32b   : > { %1594 = vmax.xlane.f32.xlu1 %v1593_v17  ;;  %v2622_v19 = vpop.f32.mrb[31].mxu0 }
 0x32c   : > { %v1934_v19 = vsel %vm1648_vm3, %v1836_v15, 0  ;;  %v2428_v15 = vld [vmem:[%s3458_s11] ss:$0 sm:$0xff] }
 0x32f   : > { %1597 = vmax.xlane.f32.xlu1 %v1596_v20 }
 0x330   : > { %v1532_v22 = vpop.f32.mrb[32].mxu0 }
 0x331   : > { %v1591_v23 = vsel %vm1588_vm4, %v1532_v22, -1e+30  ;;  %v2633_v24 = vpop.f32.mrb[33].mxu0 }
 0x332   : > { %v1535_v25 = vpop.f32.mrb[34].mxu0  ;;  %v1599_v27 = vsel %vm1399_vm2, %v1591_v23, -inf }
 0x333   : > { %1603 = vmax.xlane.f32.xlu1 %v1602_v26  ;;  %1600 = vmax.xlane.f32.xlu0 %v1599_v27  ;;  %v2634_v28 = vpop.f32.mrb[35].mxu0 }
 0x3b8   : > { %v1595_v29 = vpop.xlane.xlu1 %1594 }
 0x3b9   : > { %v1605_v30 = vsub.f32 %v1589_v14, %v1595_v29  ;;  %v1888_v14 = vsel %vm1648_vm3, %v1835_v13, 0 }
 0x3bb   : > { %v1609_v31 = vmul.f32 1.442695, %v1605_v30 }
 0x3bc   : > { %v1598_v32 = vpop.xlane.xlu1 %1597 }
 0x3bd   : > { %2794 = vpow2.f32 %v1609_v31  ;;  %v1606_v33 = vsub.f32 %v1590_v18, %v1598_v32 }
 0x3bf   : > { %v1611_v34 = vmul.f32 1.442695, %v1606_v33 }
 0x3c0   : > { %v1604_v35 = vpop.xlane.xlu1 %1603  ;;  %v1601_v36 = vpop.xlane.xlu0 %1600 }
 0x3c1   : > { %2796 = vpow2.f32 %v1611_v34  ;;  %v1608_v37 = vsub.f32 %v1592_v21, %v1604_v35  ;;  %v1607_v39 = vsub.f32 %v1591_v23, %v1601_v36  ;;  %v1837_v21 = vld [vmem:[%s3456_s9 + $0xc] sm:$0xf] }
 0x3c2   : > { %v1980_v26 = vsel %vm1648_vm3, %v1837_v21, 0  ;;  %v2785_v21 = vld [vmem:[%s3462_s15 + $0x8] sm:$0xff]  }
 0x3c3   : > { %v1615_v40 = vmul.f32 1.442695, %v1608_v37  ;;  %v1613_v41 = vmul.f32 1.442695, %v1607_v39 }
 0x3c5   : > { %2798 = vpow2.f32 %v1615_v40 }
 0x3c6   : > { %2800 = vpow2.f32 %v1613_v41 }
 0x3c7   : > { %v2795_v43 = vpop.eup %2794 }
 0x3c8   : > { %v1617_v44 = vsel %vm1399_vm2, %v2795_v43, 0.0 }
 0x3c9   : > { %1618 = vadd.xlane.f32.xlu0 %v1617_v44 }
 0x3cb   : > { %v2797_v45 = vpop.eup %2796 }
 0x3cc   : > { %v1620_v46 = vsel %vm1399_vm2, %v2797_v45, 0.0 }
 0x3cd   : > { %1621 = vadd.xlane.f32.xlu1 %v1620_v46 }
 0x3cf   : > { %v2799_v47 = vpop.eup %2798 }
 0x3d0   : > { %v2801_v48 = vpop.eup %2800  ;;  %v1626_v42 = vsel %vm1399_vm2, %v2799_v47, 0.0 }
 0x3d1   : > { %1627 = vadd.xlane.f32.xlu1 %v1626_v42  ;;  %v1623_v49 = vsel %vm1399_vm2, %v2801_v48, 0.0 }
 0x3d2   : > { %1624 = vadd.xlane.f32.xlu0 %v1623_v49 }
 0x456   : > { %v1619_v50 = vpop.xlane.xlu0 %1618 }
 0x457   : > { %2802 = vrcp.f32 %v1619_v50 }
 0x45a   : > { %v1622_v51 = vpop.xlane.xlu1 %1621 }
 0x45b   : > { %2804 = vrcp.f32 %v1622_v51 }
 0x45e   : > { %v1628_v54 = vpop.xlane.xlu1 %1627 }
 0x45f   : > { %2806 = vrcp.f32 %v1628_v54  ;;  %v1625_v56 = vpop.xlane.xlu0 %1624 }
 0x460   : > { %2808 = vrcp.f32 %v1625_v56 }
 0x461   : > { %v2803_v57 = vpop.eup %2802 }
 0x462   : > { %v1633_v61 = vmul.f32 %v2803_v57, %v2795_v43 }
 0x464   : > { %v1637_v62 = vpack.c.bf16 %v1633_v61, %v1633_v61 }
 0x465   : > { %v2805_v63 = vpop.eup %2804 }
 0x466   : > { %v1634_v3 = vmul.f32 %v2805_v63, %v2797_v45  ;;  %2644 = vmatmul.mubr.msk.bf16.vlgmr.msra.gmra.mrb[36].mxu0 %vm1399_vm2, %v1637_v62 }
 0x467   : > { %2654 = vmatpush3.bf16.msra.mxu0 %v1742_v2  ;;  %2655 = vmatprep.mubr.msk.bf16.mxu0 %vm2881_vm1, %v2880_v9 }
 0x468   : > { %v1638_v60 = vpack.c.bf16 %v1634_v3, %v1634_v3  ;;  %2665 = vmatprep.subr.bf16.mxu0 %v2880_v9 }
 0x469   : > { %v2807_v4 = vpop.eup %2806 }
 0x46a   : > { %v2809_v5 = vpop.eup %2808  ;;  %2650 = vmatmul.mubr.msk.bf16.vlgmr.msra.gmra.mrb[28].mxu1 %vm1399_vm2, %v1638_v60  ;;  %v1636_v8 = vmul.f32 %v2807_v4, %v2799_v47 }
 0x46b   : > { %v1635_v7 = vmul.f32 %v2809_v5, %v2801_v48  ;;  %2660 = vmatpush3.bf16.msra.mxu1 %v1788_v38  ;;  %2661 = vmatprep.mubr.msk.bf16.mxu1 %vm2881_vm1, %v2880_v9 }
 0x46c   : > { %2671 = vmatprep.subr.bf16.mxu1 %v2880_v9  ;;  %v1640_v12 = vpack.c.bf16 %v1636_v8, %v1636_v8  ;;  %v2782_v8 = vld [vmem:[%s3460_s13] sm:$0xff]  }
 0x46d   : > { %v1639_v10 = vpack.c.bf16 %v1635_v7, %v1635_v7 }
 0x46f   : > { %2656 = vmatmul.mubr.msk.bf16.vlgmr.msra.gmra.mrb[40].mxu0 %vm1399_vm2, %v1639_v10  ;;  %v2784_v10 = vld [vmem:[%s3462_s15] sm:$0xff]  }
 0x470   : > { %2666 = vmatpush3.bf16.msra.mxu0 %v1842_v11  ;;  %2667 = vmatprep.mubr.msk.bf16.mxu0 %vm2881_vm1, %v2880_v9 }
 0x471   : > { %2677 = vmatprep.subr.bf16.mxu0 %v2880_v9 }
 0x472   : > { %2662 = vmatmul.mubr.msk.bf16.vlgmr.msra.gmra.mrb[32].mxu1 %vm1399_vm2, %v1640_v12 }
 0x473   : > { %2673 = vmatprep.mubr.msk.bf16.mxu1 %vm2881_vm1, %v2880_v9  ;;  %2672 = vmatpush3.bf16.msra.mxu1 %v1888_v14 }
 0x474   : > { %2683 = vmatprep.subr.bf16.mxu1 %v2880_v9 }
 0x539   : > { %v1686_v16 = vpop.f32.mrb[36].mxu0 }
 0x53a   : > { %v1830_v17 = vpack.c.bf16 %v1686_v16, %v1686_v16  ;;  %v2645_v18 = vpop.f32.mrb[37].mxu0 }
 0x53b   : > { %v1689_v20 = vpop.f32.mrb[38].mxu0 }
 0x53c   : > { %v2646_v22 = vpop.f32.mrb[39].mxu0  ;;  %2668 = vmatmul.mubr.msk.bf16.vlgmr.msra.gmra.mrb[44].mxu0 %vm1399_vm2, %v1830_v17  ;;  %v2429_v17 = vld [vmem:[%s3459_s12] ss:$0 sm:$0xff] }
 0x53d   : > { %v1732_v23 = vpop.f32.mrb[28].mxu1  ;;  %2678 = vmatpush3.bf16.msra.mxu0 %v1934_v19  ;;  %2679 = vmatprep.mubr.msk.bf16.mxu0 %vm2881_vm1, %v2880_v9  ;;  %v2786_v22 = vld [vmem:[%s3462_s15 + $0x10] sm:$0xff]  }
 0x53e   : > { %v1831_v24 = vpack.c.bf16 %v1732_v23, %v1732_v23  ;;  %v2651_v25 = vpop.f32.mrb[29].mxu1  ;;  %2689 = vmatprep.subr.bf16.mxu0 %v2880_v9  ;;  %v2787_v23 = vld [vmem:[%s3462_s15 + $0x18] sm:$0xff]  }
 0x53f   : > { %v1735_v27 = vpop.f32.mrb[30].mxu1  ;;  %v2789_v25 = vld [vmem:[%s3462_s15 + $0x28] sm:$0xff]  }
 0x540   : > { %v2652_v28 = vpop.f32.mrb[31].mxu1  ;;  %2674 = vmatmul.mubr.msk.bf16.vlgmr.msra.gmra.mrb[36].mxu1 %vm1399_vm2, %v1831_v24  ;;  %v2788_v24 = vld [vmem:[%s3462_s15 + $0x20] sm:$0xff]   ;;  %v2791_v27 = vld [vmem:[%s3462_s15 + $0x38] sm:$0xff]  }
 0x541   : > { %2684 = vmatpush3.bf16.msra.mxu1 %v1980_v26  ;;  %2685 = vmatprep.mubr.msk.bf16.mxu1 %vm2881_vm1, %v2880_v9  ;;  %v2790_v26 = vld [vmem:[%s3462_s15 + $0x30] sm:$0xff]   ;;  %v2430_v28 = vld [vmem:[%s3461_s14] ss:$0 sm:$0xff] }
 0x542   : > { %v1778_v29 = vpop.f32.mrb[40].mxu0  ;;  %2697 = vmatprep.subr.bf16.mxu1 %v2880_v9 }
 0x543   : > { %v1832_v30 = vpack.c.bf16 %v1778_v29, %v1778_v29  ;;  %v2657_v31 = vpop.f32.mrb[41].mxu0 }
 0x544   : > { %v1781_v32 = vpop.f32.mrb[42].mxu0 }
 0x545   : > { %v2658_v33 = vpop.f32.mrb[43].mxu0  ;;  %2680 = vmatmul.mubr.msk.bf16.vlgmr.msra.gmra.mrb[48].mxu0 %vm1399_vm2, %v1832_v30  ;;  %v1824_v34 = vpop.f32.mrb[32].mxu1 }
 0x546   : > { %v1833_v35 = vpack.c.bf16 %v1824_v34, %v1824_v34  ;;  %v2663_v36 = vpop.f32.mrb[33].mxu1  ;;  %2693 = vmatprep.mubr.msk.bf16.mxu0 %vm2881_vm1, %v2880_v9  ;;  %2690 = vmatpush3.bf16.msra.mxu0 %v2782_v8 }
 0x547   : > { %v1827_v37 = vpop.f32.mrb[34].mxu1  ;;  %2691 = vmatprep.subr.bf16.mxu0 %v2880_v9 }
 0x548   : > { %v2664_v39 = vpop.f32.mrb[35].mxu1  ;;  %2686 = vmatmul.mubr.msk.bf16.vlgmr.msra.gmra.mrb[40].mxu1 %vm1399_vm2, %v1833_v35 }
 0x549   : > { %2713 = vmatprep.mubr.msk.bf16.mxu1 %vm2881_vm1, %v2880_v9  ;;  %2698 = vmatpush3.bf16.msra.mxu1 %v2784_v10 }
 0x54a   : > { %2699 = vmatprep.subr.bf16.mxu1 %v2880_v9 }
 0x54d   : > { %2700 = vmatpush3.bf16.msra.mxu1 %v2785_v21 }
 0x54e   : > { %2701 = vmatprep.subr.bf16.mxu1 %v2880_v9 }
 0x551   : > { %2702 = vmatpush3.bf16.msra.mxu1 %v2786_v22 }
 0x552   : > { %2703 = vmatprep.subr.bf16.mxu1 %v2880_v9 }
 0x555   : > { %2704 = vmatpush3.bf16.msra.mxu1 %v2787_v23 }
 0x556   : > { %2705 = vmatprep.subr.bf16.mxu1 %v2880_v9 }
 0x559   : > { %2706 = vmatpush3.bf16.msra.mxu1 %v2788_v24 }
 0x55a   : > { %2707 = vmatprep.subr.bf16.mxu1 %v2880_v9 }
 0x55d   : > { %2708 = vmatpush3.bf16.msra.mxu1 %v2789_v25 }
 0x55e   : > { %2709 = vmatprep.subr.bf16.mxu1 %v2880_v9 }
 0x561   : > { %2710 = vmatpush3.bf16.msra.mxu1 %v2790_v26 }
 0x562   : > { %2711 = vmatprep.subr.bf16.mxu1 %v2880_v9 }
 0x565   : > { %2712 = vmatpush3.bf16.msra.mxu1 %v2791_v27 }
 0x60f   : > { %v1878_v40 = vpop.f32.mrb[44].mxu0 }
 0x610   : > { %v2669_v41 = vpop.f32.mrb[45].mxu0  ;;  %v2022_v46 = vsel %vm602_vm0, %v1878_v40, 0.0 }
 0x611   : > { %v1881_v43 = vpop.f32.mrb[46].mxu0 }
 0x612   : > { %v2670_v44 = vpop.f32.mrb[47].mxu0 }
 0x613   : > { %v1924_v45 = vpop.f32.mrb[36].mxu1 }
 0x614   : > { %v2023_v47 = vsel %vm602_vm0, %v1924_v45, 0.0  ;;  %v2675_v48 = vpop.f32.mrb[37].mxu1  ;;  %v2434_v45 = vld [vmem:[%s3463_s16] ss:$0 sm:$0xff] }
 0x615   : > { %v2024_v42 = vadd.f32 %v2023_v47, %v2022_v46  ;;  %v1927_v49 = vpop.f32.mrb[38].mxu1 }
 0x616   : > { %v2676_v50 = vpop.f32.mrb[39].mxu1 }
 0x618   : > { %v1970_v51 = vpop.f32.mrb[48].mxu0 }
 0x619   : > { %v2025_v52 = vsel %vm602_vm0, %v1970_v51, 0.0  ;;  %v2681_v53 = vpop.f32.mrb[49].mxu0 }
 0x61a   : > { %v2026_v54 = vadd.f32 %v2025_v52, %v2024_v42  ;;  %v1973_v55 = vpop.f32.mrb[50].mxu0 }
 0x61b   : > { %v2682_v56 = vpop.f32.mrb[51].mxu0  ;;  %v2016_v57 = vpop.f32.mrb[40].mxu1 }
 0x61c   : > { %v2027_v58 = vsel %vm602_vm0, %v2016_v57, 0.0  ;;  %v2687_v59 = vpop.f32.mrb[41].mxu1 }
 0x61d   : > { %v2028_v61 = vadd.f32 %v2027_v58, %v2026_v54  ;;  %v2019_v62 = vpop.f32.mrb[42].mxu1 }
 0x61e   : > { %v2688_v63 = vpop.f32.mrb[43].mxu1  ;;  %v2443_v62 = vld [vmem:[%s3464_s17] ss:$0 sm:$0xff] }
 0x61f   : > { %v2029_v2 = vadd.f32 %v2028_v61, %v3036_v0  ;;  %v2783_v0 = vld [vmem:[%s3460_s13 + $0x8] sm:$0xff]  }
 0x620   : > { %2692 = vmatpush3.bf16.msra.mxu0 %v2783_v0 }
 0x621   : > { %v3333_v3 = vadd.f32 %v2427_v1, %v2029_v2  ;;  %v2444_v1 = vld [vmem:[%s3465_s18] ss:$0 sm:$0xff] }
 0x623   : > { %v2040_v60 = vsel %vm602_vm0, %v3333_v3, 0.0 }
 0x624   : > { %2041 = vadd.xlane.f32.xlu0 %v2040_v60 }
 0x6b1   : > { %v2042_v4 = vpop.xlane.xlu0 %2041 }
 0x6b2   : > { %v2043_v5 = vmul.f32 0.03125, %v2042_v4 }
 0x6b4   : > { %v2044_v38 = vsub.f32 %v3333_v3, %v2043_v5 }
 0x6b6   : > { %v2045_v6 = vmul.f32 %v2044_v38, %v2044_v38 }
 0x6b8   : > { %v2046_v7 = vsel %vm602_vm0, %v2045_v6, 0.0 }
 0x6b9   : > { %2047 = vadd.xlane.f32.xlu1 %v2046_v7 }
 0x746   : > { %v2048_v11 = vpop.xlane.xlu1 %2047 }
 0x747   : > { %v2049_v12 = vmul.f32 0.03125, %v2048_v11 }
 0x749   : > { %v2050_v13 = vadd.f32 1e-05, %v2049_v12 }
 0x74b   : > { %2810 = vrsqrt.f32 %v2050_v13 }
 0x755   : > { %v2811_v14 = vpop.eup %2810 }
 0x756   : > { %v2052_v16 = vmul.f32 %v2811_v14, %v2044_v38 }
 0x758   : > { %v2059_v18 = vmul.f32 %v2428_v15, %v2052_v16 }
 0x75a   : > { %v2066_v19 = vadd.f32 %v2429_v17, %v2059_v18 }
 0x75c   : > { %v2067_v20 = vpack.c.bf16 %v2066_v19, %v2066_v19 }
 0x75e   : > { %2694 = vmatmul.mubr.msk.bf16.vlgmr.msra.gmra.mrb[52].mxu0 %vm602_vm0, %v2067_v20 }
 0x831   : > { %v2128_v29 = vpop.f32.mrb[52].mxu0 }
 0x832   : > { %v2129_v30 = vadd.f32 %v2430_v28, %v2128_v29  ;;  %v2695_v31 = vpop.f32.mrb[53].mxu0 }
 0x833   : > { %v2131_v32 = vpop.f32.mrb[54].mxu0 }
 0x834   : > { %v2135_v33 = vmul.f32 0.044715, %v2129_v30  ;;  %v2696_v34 = vpop.f32.mrb[55].mxu0  ;;  %v2134_v41 = vmul.f32 0.5, %v2129_v30 }
 0x836   : > { %v2136_v35 = vmul.f32 %v2135_v33, %v2129_v30 }
 0x838   : > { %v2137_v36 = vmul.f32 %v2136_v35, %v2129_v30 }
 0x83a   : > { %v2138_v37 = vadd.f32 %v2137_v36, %v2129_v30 }
 0x83c   : > { %v2139_v39 = vmul.f32 0.7978846, %v2138_v37 }
 0x83e   : > { %2812 = vtanh.f32 %v2139_v39 }
 0x848   : > { %v2813_v40 = vpop.eup %2812 }
 0x849   : > { %v2141_v43 = vadd.f32 1.0, %v2813_v40 }
 0x84b   : > { %v2142_v9 = vmul.f32 %v2141_v43, %v2134_v41 }
 0x84d   : > { %v2143_v44 = vpack.c.bf16 %v2142_v9, %v2142_v9 }
 0x84f   : > { %2714 = vmatmul.mubr.bf16.vlgmr.msra.gmra.mrb[44].mxu1 %v2143_v44 }
 0x922   : > { %v2249_v46 = vpop.f32.mrb[44].mxu1 }
 0x923   : > { %v2250_v47 = vadd.f32 %v2434_v45, %v2249_v46  ;;  %v2715_v48 = vpop.f32.mrb[45].mxu1 }
 0x924   : > { %v2252_v42 = vpop.f32.mrb[46].mxu1 }
 0x925   : > { %v2716_v49 = vpop.f32.mrb[47].mxu1  ;;  %v2255_v50 = vadd.f32 %v2250_v47, %v3333_v3 }
 0x927   : > { %v2258_v51 = vsel %vm602_vm0, %v2255_v50, 0.0 }
 0x928   : > { %2259 = vadd.xlane.f32.xlu0 %v2258_v51 }
 0x9b5   : > { %v2260_v52 = vpop.xlane.xlu0 %2259 }
 0x9b6   : > { %v2261_v53 = vmul.f32 0.03125, %v2260_v52 }
 0x9b8   : > { %v2262_v54 = vsub.f32 %v2255_v50, %v2261_v53 }
 0x9ba   : > { %v2263_v55 = vmul.f32 %v2262_v54, %v2262_v54 }
 0x9bc   : > { %v2264_v56 = vsel %vm602_vm0, %v2263_v55, 0.0 }
 0x9bd   : > { %2265 = vadd.xlane.f32.xlu1 %v2264_v56 }
 0xa4a   : > { %v2266_v57 = vpop.xlane.xlu1 %2265 }
 0xa4b   : > { %v2267_v58 = vmul.f32 0.03125, %v2266_v57 }
 0xa4d   : > { %v2268_v59 = vadd.f32 1e-05, %v2267_v58 }
 0xa4f   : > { %2814 = vrsqrt.f32 %v2268_v59 }
 0xa59   : > { %v2815_v61 = vpop.eup %2814 }
 0xa5a   : > { %v2270_v63 = vmul.f32 %v2815_v61, %v2262_v54 }
 0xa5c   : > { %v2277_v2 = vmul.f32 %v2443_v62, %v2270_v63 }
 0xa5e   : > { %v2284_v3 = vadd.f32 %v2444_v1, %v2277_v2 }
 0xa60   : > { %2285 = vst.msk [vmem:[%s593_s26] sm:$0xff] %vm602_vm0, %v2284_v3 }
 0xa61   : > { %2829 = shalt.err (!%p2826_p3)
}
 0xa62   : > { %s2830_s2 = scalar_lea.hbm %s3404_s4, 128  ;;  %s2834_s0 = scalar_lea.hbm %s3466_s19, 256 }
 0xa63   : > { %p2831_p4 = scmp.ne.s32.totalorder %s3404_s4, %s2830_s2  ;;  %p2835_p9 = scmp.lt.u32.totalorder %s3404_s4, %s3466_s19 }
 0xa64   : > { %p2836_p10 = scmp.lt.u32.totalorder %s2834_s0, %s2830_s2  ;;  %p2838_p12 = scmp.lt.u32.totalorder %s2830_s2, %s3404_s4 }
 0xa65   : > { %p2832_p7 = pnand %p2831_p4, %p3021_p5 }
 0xa66   : > { %p2837_p11 = por %p2836_p10, %p2835_p9 }
 0xa67   : > { %p2833_p8 = pneg %p2832_p7 }
 0xa68   : > { %p2839_p13 = por %p2838_p12, %p2837_p11 }
 0xa6a   : > { %p2840_p0 = pnand %p2839_p13, %p2833_p8 }
 0xa6c   : > { %2843 = shalt.err (!%p2840_p0)
}
 0xa6d   : > { %2717 = dma.vmem_to_hbm [thread:$0]  (%p3021_p5), %s3406_s22, 128, %s3404_s4, %s2287_s24  }
 0xa6e PF: > { %s3492_s27 = sld [smem:[#allocation5_spill]]  ;;  %p2723_p1 = scmp.ge.s32.totalorder %s2878_s21, 2 }
 0xa70   : > { %p2720_p2 = pnand %p2723_p1, %p3025_p6 }
 0xa74   : > { %s2312_s25 = sand.u32 1, %s3492_s27  }
 0xa75   : > { %s2313_s29 = scalar_lea.sflag [#allocation3], %s2312_s25 }
 0xa76   : > { %2861 = dma.done.wait (!%p2720_p2), %s2313_s29, 128  }
 0xa77   : > { %2863 = vsyncadd (!%p2720_p2), %s2313_s29, 4294967168  ;;  %s3494_s21 = sld [smem:[#allocation7_spill]]  ;;  %s3495_s2 = sld [smem:[#allocation6_spill]] }
 0xa78   : > { %s3496_s20 = sld [smem:[#allocation8_spill]]  ;;  %s3497_s0 = smov %s2870_s30 }
 0xa7d   : > { %p29_p3 = scmp.ge.s32.totalorder %s3494_s21, 4   ;;  %s3498_s30 = smov %s3495_s2 }
 0xa7f   :  { %31 = sbr.rel (!%p29_p3) target bundleno = 9 (0x9), region = 131 }
 0xa86   :  { %2318 = vsyncpa [#allocation3], 1 }
 0xa87   :  { %2320 = vsyncpa [#allocation3 + $0x1], 1 }

</bundles_post_ra>
